<compile_context>
chip_gen: v6e
topology: v6e:2x2x1
jax: 0.10.0
libtpu: 0.0.40
codegen_flags: <defaults>
</compile_context>

<pallas_src>
import functools

import jax
import jax.numpy as jnp
from jax.experimental import pallas as pl
from jax.experimental.pallas import tpu as pltpu


def _framing_kernel(lo_ref, prev_ref, out_ref, *, L, F, P):
    """lo_ref  : [BT, F, P]  x-chunks c0 .. c0+F-1              (c0 = si * F)
       prev_ref: [BT, 8, P]  x-chunks c0-8 .. c0-1 (only the last one is consumed)
       out_ref : [BT, K, F]  out[:, k, j] = padded[(c0+j)*P + k],  K = 2*P

    Frame s = padded-chunk s ++ padded-chunk s+1, and padded-chunk c = x-chunk c-1
    (zeros for c == 0 and beyond the signal), so with c0 = si*F:
      out[:, P:, j] = x-chunk (c0 + j)      -> transposed lo block (stored directly)
      out[:, :P, j] = x-chunk (c0 + j - 1)  -> same block rolled by one lane; lane 0 patched
                                               with x-chunk c0-1 (fused front pad when si==0).
    """
    si = pl.program_id(1)
    c0 = si * F
    zero = jnp.zeros((), out_ref.dtype)

    # Fused tail padding: every logical sample index >= L is zero (this also masks the
    # undefined VMEM contents of partial / clamped edge blocks).
    lo = lo_ref[...]                                              # [BT, F, P]
    pos = (jax.lax.broadcasted_iota(jnp.int32, (1, F, P), 1) * P
           + jax.lax.broadcasted_iota(jnp.int32, (1, F, P), 2))
    lo = jnp.where(pos < L - c0 * P, lo, zero)

    # Single K<->S transpose: frame index onto the lane axis.
    lo_t = jnp.swapaxes(lo, 1, 2)                                 # [BT, P, F]
    out_ref[:, P:, :] = lo_t                                      # second half of each frame

    # First half of each frame: previous chunk -> roll by one lane, patch lane column 0.
    rolled = pltpu.roll(lo_t, shift=1, axis=2)                    # rolled[..., j] = lo_t[..., j-1]
    prev_t = jnp.swapaxes(prev_ref[...], 1, 2)                    # [BT, P, 8]
    prev_col = prev_t[:, :, 7:8]                                  # x-chunk c0-1 -> [BT, P, 1]
    p_sub = jax.lax.broadcasted_iota(jnp.int32, (1, P, 1), 1)
    prev_ok = jnp.logical_and(si > 0, (c0 - 1) * P + p_sub < L)   # front pad / tail masking
    prev_col = jnp.where(prev_ok, prev_col, zero)
    lane = jax.lax.broadcasted_iota(jnp.int32, (1, 1, F), 2)
    out_ref[:, :P, :] = jnp.where(lane == 0, prev_col, rolled)


def framing_forward(x, length, *, batch_tile=8, frames_per_block=256):
    """JAX/Pallas equivalent of framing(length).forward(x).  x: [B, L] -> ([B, K, S], gap)."""
    B, L = x.shape
    K = length
    P = K // 2
    assert K == 2 * P and P % 128 == 0, "kernel layout needs hop size P = K/2 multiple of 128"
    assert jnp.dtype(x.dtype).itemsize == 4, "kernel is laid out for 32-bit dtypes"

    gap = K - (P + L % K) % K             # mirrors PyTorch: gap == K when already aligned
    S = (L + gap + P) // P                # number of hop-P frames (numerator divisible by P)

    # Frames per grid step == output lane width (review: >= 256 for >= 2 KiB output runs).
    NC_raw = -(-L // P)
    F = frames_per_block if NC_raw >= frames_per_block else 128

    # Fast path: x is reinterpreted as hop-size chunks for free (no HBM copy); all padding is
    # applied inside the kernel.  Unaligned / very short signals do one minimal pad copy.
    # TODO(synk): manual-DMA (memory_space=pl.ANY) path so unaligned L is zero-copy as well.
    L_pad = max(NC_raw * P, F * P)
    if L_pad != L:
        x = jnp.concatenate([x, jnp.zeros((B, L_pad - L), x.dtype)], axis=1)
    NC = L_pad // P
    chunks = x.reshape(B, NC, P)          # chunks[b, c, :] == x[b, c*P:(c+1)*P]   (free view)

    s_grid = pl.cdiv(S, F)
    S_out = S if S >= F else F            # tiny inputs: pad frame axis, slice afterwards

    BT = min(B, batch_tile)
    b_grid = pl.cdiv(B, BT)
    if b_grid * s_grid < 2 and B >= 2:    # keep both v7x TensorCores fed
        BT = (B + 1) // 2
        b_grid = pl.cdiv(B, BT)

    # Clamp index maps so block starts stay in bounds; any clamped (i.e. fully out-of-range)
    # block is entirely zeroed by the in-kernel tail mask, so correctness is unaffected.
    max_lo_blk = (NC - 1) // F
    max_pr_blk = (NC - 1) // 8
    FB = F // 8

    kernel = functools.partial(_framing_kernel, L=L, F=F, P=P)

    itemsize = jnp.dtype(x.dtype).itemsize
    cost = pl.CostEstimate(               # pure data movement: mark as bandwidth-bound
        flops=0, transcendentals=0,
        bytes_accessed=(B * L_pad + B * K * S_out) * itemsize)

    out = pl.pallas_call(
        kernel,
        grid=(b_grid, s_grid),
        in_specs=[
            # F consecutive hop chunks for this frame block (second halves of its frames).
            pl.BlockSpec((BT, F, P),
                         lambda bi, si: (bi, jnp.minimum(si, max_lo_blk), 0)),
            # The aligned 8-chunk block just before them (only its last chunk is consumed).
            pl.BlockSpec((BT, 8, P),
                         lambda bi, si: (bi,
                                         jnp.minimum(jnp.maximum(si * FB - 1, 0), max_pr_blk),
                                         0)),
        ],
        # Optional knob to sweep: pipeline_mode=pl.Buffered(3) on this spec to deepen the
        # writeback pipeline (purely mem-bound kernel); left at default for portability.
        out_specs=pl.BlockSpec((BT, K, F), lambda bi, si: (bi, 0, si)),
        out_shape=jax.ShapeDtypeStruct((B, K, S_out), x.dtype),
        compiler_params=pltpu.CompilerParams(
            dimension_semantics=("parallel", "parallel"),
            vmem_limit_bytes=32 * 1024 * 1024),
        cost_estimate=cost,
    )(chunks, chunks)

    if S_out != S:
        out = out[:, :, :S]               # tiny-input path only (extra pass over a tiny output)
    return out, gap


def framing_reference(x, length):
    """Pure-JAX transcription of the PyTorch forward, for verification."""
    B, L = x.shape
    P = length // 2
    gap = length - (P + L % length) % length
    if gap > 0:
        x = jnp.concatenate([x, jnp.zeros((B, gap), x.dtype)], axis=1)
    edge = jnp.zeros((B, P), x.dtype)
    inp = jnp.concatenate([edge, x, edge], axis=1)
    in1 = inp[:, :-P].reshape(B, -1, length)
    in2 = inp[:, P:].reshape(B, -1, length)
    out = jnp.concatenate([in1, in2], axis=2).reshape(B, -1, length)
    return jnp.transpose(out, (0, 2, 1)), gap


if __name__ == "__main__":
    length = 256                          # window K (P = 128 -> lane-aligned layout)
    keys = jax.random.split(jax.random.PRNGKey(0), 3)

    cases = [
        (2, 32768),   # L multiple of P and >= F*P: zero-copy fused path, multi frame-block
                      # (also exercises the clamped, fully-masked last input block)
        (2, 4000),    # short + unaligned: minimal-pad fallback, S < F, batch-split grid
        (4, 20000),   # unaligned, medium: minimal-pad fallback, partial edge frame block
    ]
    for key, (B, L) in zip(keys, cases):
        x = jax.random.normal(key, (B, L), dtype=jnp.float32)
        out, gap = framing_forward(x, length)
        out = jax.block_until_ready(out)
        ref, rgap = framing_reference(x, length)
        assert gap == rgap, (gap, rgap)
        assert out.shape == ref.shape, (out.shape, ref.shape)
        assert jnp.allclose(out, ref), f"Pallas framing mismatch vs reference (B={B}, L={L})"

    print("KERNEL_OK")
</pallas_src>

<mosaic_0001>
module attributes {stable_mosaic.version = 11 : i64} {
  func.func @_framing_kernel(%arg0: i32, %arg1: i32, %arg2: memref<2x256x128xf32, #tpu.memory_space<vmem>>, %arg3: memref<2x8x128xf32, #tpu.memory_space<vmem>>, %arg4: memref<2x256x256xf32, #tpu.memory_space<vmem>>) attributes {dimension_semantics = [#tpu.dimension_semantics<parallel>, #tpu.dimension_semantics<parallel>], iteration_bounds = array<i64: 1, 2>, scalar_prefetch = 0 : i64, scratch_operands = 0 : i64, tpu.core_type = #tpu.core_type<tc>, window_params = [{transform_indices = @transform_0, window_bounds = array<i64: 2, 256, 128>}, {transform_indices = @transform_1, window_bounds = array<i64: 2, 8, 128>}, {transform_indices = @transform_2, window_bounds = array<i64: 2, 256, 256>}]} {
    %c256_i32 = arith.constant 256 : i32
    %0 = arith.muli %arg1, %c256_i32 : i32
    %c0 = arith.constant 0 : index
    %c0_0 = arith.constant 0 : index
    %c0_1 = arith.constant 0 : index
    %1 = vector.load %arg2[%c0, %c0_0, %c0_1] : memref<2x256x128xf32, #tpu.memory_space<vmem>>, vector<2x256x128xf32>
    %2 = tpu.iota {dimensions = array<i32: 1>} : vector<1x256x128xi32>
    %c128_i32 = arith.constant 128 : i32
    %3 = vector.broadcast %c128_i32 : i32 to vector<1x256x128xi32>
    %4 = arith.muli %2, %3 : vector<1x256x128xi32>
    %5 = tpu.iota {dimensions = array<i32: 2>} : vector<1x256x128xi32>
    %6 = arith.addi %4, %5 : vector<1x256x128xi32>
    %c128_i32_2 = arith.constant 128 : i32
    %7 = arith.muli %0, %c128_i32_2 : i32
    %c32768_i32 = arith.constant 32768 : i32
    %8 = arith.subi %c32768_i32, %7 : i32
    %9 = vector.broadcast %8 : i32 to vector<1x256x128xi32>
    %10 = arith.cmpi slt, %6, %9 : vector<1x256x128xi32>
    %cst = arith.constant 0.000000e+00 : f32
    %11 = vector.shape_cast %10 : vector<1x256x128xi1> to vector<1x256x128xi1>
    %12 = vector.broadcast %11 : vector<1x256x128xi1> to vector<2x256x128xi1>
    %13 = vector.broadcast %cst : f32 to vector<2x256x128xf32>
    %14 = arith.select %12, %1, %13 : vector<2x256x128xi1>, vector<2x256x128xf32>
    %15 = tpu.transpose %14, [0, 2, 1] : vector<2x256x128xf32> -> vector<2x128x256xf32>
    %c0_3 = arith.constant 0 : index
    %c128 = arith.constant 128 : index
    %c0_4 = arith.constant 0 : index
    %16 = vector.load %arg4[%c0_3, %c128, %c0_4] : memref<2x256x256xf32, #tpu.memory_space<vmem>>, vector<2x128x256xf32>
    tpu.vector_store %arg4[%c0_3, %c128, %c0_4], %15 {strides = array<i32>} : memref<2x256x256xf32, #tpu.memory_space<vmem>>, vector<2x128x256xf32>,
    %c1_i32 = arith.constant 1 : i32
    %17 = tpu.dynamic_rotate %15 by %c1_i32 dim 2 : vector<2x128x256xf32>, i32 -> vector<2x128x256xf32>
    %c0_5 = arith.constant 0 : index
    %c0_6 = arith.constant 0 : index
    %c0_7 = arith.constant 0 : index
    %18 = vector.load %arg3[%c0_5, %c0_6, %c0_7] : memref<2x8x128xf32, #tpu.memory_space<vmem>>, vector<2x8x128xf32>
    %19 = tpu.transpose %18, [0, 2, 1] : vector<2x8x128xf32> -> vector<2x128x8xf32>
    %20 = vector.extract_strided_slice %19 {offsets = [0, 0, 7], sizes = [2, 128, 1], strides = [1, 1, 1]} : vector<2x128x8xf32> to vector<2x128x1xf32>
    %21 = tpu.iota {dimensions = array<i32: 1>} : vector<1x128x1xi32>
    %c0_i32 = arith.constant 0 : i32
    %22 = arith.cmpi sgt, %arg1, %c0_i32 : i32
    %c1_i32_8 = arith.constant 1 : i32
    %23 = arith.subi %0, %c1_i32_8 : i32
    %c128_i32_9 = arith.constant 128 : i32
    %24 = arith.muli %23, %c128_i32_9 : i32
    %25 = vector.broadcast %24 : i32 to vector<1x128x1xi32>
    %26 = arith.addi %25, %21 : vector<1x128x1xi32>
    %c32768_i32_10 = arith.constant 32768 : i32
    %27 = vector.broadcast %c32768_i32_10 : i32 to vector<1x128x1xi32>
    %28 = arith.cmpi slt, %26, %27 : vector<1x128x1xi32>
    %29 = vector.broadcast %22 : i1 to vector<1x128x1xi1>
    %30 = arith.andi %29, %28 : vector<1x128x1xi1>
    %cst_11 = arith.constant 0.000000e+00 : f32
    %31 = vector.shape_cast %30 : vector<1x128x1xi1> to vector<1x128x1xi1>
    %32 = vector.broadcast %31 : vector<1x128x1xi1> to vector<2x128x1xi1>
    %33 = vector.broadcast %cst_11 : f32 to vector<2x128x1xf32>
    %34 = arith.select %32, %20, %33 : vector<2x128x1xi1>, vector<2x128x1xf32>
    %35 = tpu.iota {dimensions = array<i32: 2>} : vector<1x1x256xi32>
    %c0_i32_12 = arith.constant 0 : i32
    %36 = vector.broadcast %c0_i32_12 : i32 to vector<1x1x256xi32>
    %37 = arith.cmpi eq, %35, %36 : vector<1x1x256xi32>
    %38 = vector.shape_cast %37 : vector<1x1x256xi1> to vector<1x1x256xi1>
    %39 = vector.broadcast %38 : vector<1x1x256xi1> to vector<2x128x256xi1>
    %40 = vector.shape_cast %34 : vector<2x128x1xf32> to vector<2x128x1xf32>
    %41 = vector.broadcast %40 : vector<2x128x1xf32> to vector<2x128x256xf32>
    %42 = arith.select %39, %41, %17 : vector<2x128x256xi1>, vector<2x128x256xf32>
    %c0_13 = arith.constant 0 : index
    %c0_14 = arith.constant 0 : index
    %c0_15 = arith.constant 0 : index
    %43 = vector.load %arg4[%c0_13, %c0_14, %c0_15] : memref<2x256x256xf32, #tpu.memory_space<vmem>>, vector<2x128x256xf32>
    tpu.vector_store %arg4[%c0_13, %c0_14, %c0_15], %42 {strides = array<i32>} : memref<2x256x256xf32, #tpu.memory_space<vmem>>, vector<2x128x256xf32>,
    return
  }
  func.func @transform_0(%arg0: i32, %arg1: i32) -> (i32, i32, i32) {
    %c0_i32 = arith.constant 0 : i32
    %0 = arith.minsi %arg1, %c0_i32 : i32
    %c0_i32_0 = arith.constant 0 : i32
    %c0_i32_1 = arith.constant 0 : i32
    return %arg0, %0, %c0_i32_0 : i32, i32, i32
  }
  func.func @transform_1(%arg0: i32, %arg1: i32) -> (i32, i32, i32) {
    %c32_i32 = arith.constant 32 : i32
    %0 = arith.muli %arg1, %c32_i32 : i32
    %c1_i32 = arith.constant 1 : i32
    %1 = arith.subi %0, %c1_i32 : i32
    %c0_i32 = arith.constant 0 : i32
    %2 = arith.maxsi %1, %c0_i32 : i32
    %c31_i32 = arith.constant 31 : i32
    %3 = arith.minsi %2, %c31_i32 : i32
    %c0_i32_0 = arith.constant 0 : i32
    %c0_i32_1 = arith.constant 0 : i32
    return %arg0, %3, %c0_i32_0 : i32, i32, i32
  }
  func.func @transform_2(%arg0: i32, %arg1: i32) -> (i32, i32, i32) {
    %c0_i32 = arith.constant 0 : i32
    %c0_i32_0 = arith.constant 0 : i32
    return %arg0, %c0_i32, %arg1 : i32, i32, i32
  }
}

</mosaic_0001>

<bundles_post_ra>
// kernel: tpu_custom_call.1
= control target key start
LH: loop header
LB: loop body
LE: loop exit
PB: predicated region body
PF: predicated region fallthrough
CT: control target
= control target key end

     0   :  { %s5411_s0 = inlined_call_operand.hbm [shape: f32[2,256,128], index: 0, kind: input, shape index: {}]   ;;  %s5412_s1 = inlined_call_operand.hbm [shape: f32[2,256,128], index: 1, kind: input, shape index: {}]   ;;  %s5413_s2 = inlined_call_operand.vmem [shape: f32[2,256,258], index: 2, kind: output, shape index: {}]  }
   0x1   :  { %5447 = sst [smem:[#allocation17_spill]] %s5411_s0 }
   0x2   :  { %7 = vsyncpa [#allocation3], 0 }
   0x3   :  { %9 = vsyncpa [#allocation3 + $0x1], 0 }
   0x4   :  { %10 = vsyncpa [#allocation5], 0 }
   0x5   :  { %12 = vsyncpa [#allocation5 + $0x1], 0  ;;  %s2686_s9 = smov 0   ;;  %s2688_s10 = smov 0  }
   0x6   :  { %s2690_s11 = smov 0   ;;  %s2692_s12 = smov 0  }
   0x7   :  { %s2694_s13 = smov 0   ;;  %s2696_s14 = smov 0  }
   0x8   :  { %s2698_s15 = smov 0   ;;  %s2700_s16 = smov 0  }
   0x9   :  { %s2702_s17 = smov 0   ;;  %s2704_s18 = smov 0  }
   0xa LB: > { %s2210_s19 = sadd.s32 4294967295, %s2628_s18   ;;  %s27_s20 = sadd.s32 1, %s2624_s17  ;;  %s2628_s18 = sphi %s2704_s18, %s18_s18   ;;  %s2624_s17 = sphi %s2702_s17, %s5549_s17   ;;  %s2620_s16 = sphi %s2700_s16, %s5548_s16   ;;  %s2616_s15 = sphi %s2698_s15, %s5401_s15   ;;  %s2612_s14 = sphi %s2696_s14, %s5547_s14   ;;  %s2608_s13 = sphi %s2694_s13, %s5546_s13   ;;  %s2604_s12 = sphi %s2692_s12, %s5545_s12   ;;  %s2600_s11 = sphi %s2690_s11, %s5544_s11   ;;  %s2596_s10 = sphi %s2688_s10, %s5543_s10   ;;  %s2592_s9 = sphi %s2686_s9, %s5542_s9  }
   0xb   : > { %p28_p0 = scmp.ge.s32.totalorder %s27_s20, 2  ;;  %p2589_p1 = scmp.ne.s32.totalorder %s2616_s15, 0 }
   0xc   : > { %p5415_p2 = scmp.eq.s32.totalorder %s2628_s18, 0  ;;  %p56_p3 = scmp.ne.s32.totalorder %s2616_s15, %s2612_s14 }
   0xd   : > { %s5551_s20 = smov (%p28_p0, %s27_s20), 0  ;;  %p2741_p4 = scmp.eq.s32.totalorder %s2210_s19, 0 }
   0xe   : > { %p52_p5 = por %p2589_p1, %p5415_p2  ;;  %s107_s23 = ssub.s32 %s2624_s17, %s5551_s20 }
   0xf   : > { %s5448_s21 = scalar_select %p2741_p4, 1, 0 }
  0x10   : > { %p2749_p6 = por %p2741_p4, %p56_p3  ;;  %p109_p7 = scmp.eq.s32.totalorder %s107_s23, 0 }
  0x11   : > { %s111_s24 = sadd.s32 1, %s2596_s10  ;;  %p121_p8 = scmp.ne.s32.totalorder %s2596_s10, %s2592_s9 }
  0x12   : > { %s5449_s22 = scalar_select %p2749_p6, 1, 0 }
  0x13   : > { %s2759_s25 = scalar_select %p109_p7, %s2596_s10, %s111_s24  }
  0x14   : > { %p122_p9 = scmp.eq.s32.totalorder %s2210_s19, 1  ;;  %p5414_p10 = scmp.lt.s32.totalorder %s2628_s18, 2 }
  0x15   : > { %s2662_s27 = smov [#allocation2]   ;;  %s5452_s0 = sld [smem:[#allocation17_spill]] }
  0x16   : > { %p2762_p11 = por %p122_p9, %p121_p8  ;;  %s164_s28 = sshll.u32 %s2662_s27, 4  ;;  %s165_s28 = int_to_ptr.vmem [resolvable:$true] %s164_s28 }
  0x17   : > { %p2768_p12 = pnand %p5414_p10, %p52_p5 }
  0x18   : > { %s5450_s26 = scalar_select %p2762_p11, 1, 0 }
  0x19   : > { %p2451_p0 = pneg %p2768_p12 }
  0x1b   : > { %s2449_s4 = scalar_lea.hbm %s5452_s0, 8192 }
  0x1c   : > { %p2450_p13 = scmp.ne.s32.totalorder %s5452_s0, %s2449_s4  ;;  %p2456_p7 = scmp.lt.s32.totalorder %s2449_s4, %s2449_s4 }
  0x1e   : > { %p2452_p1 = pnand %p2451_p0, %p2450_p13 }
  0x20   : > { %p2453_p3 = pneg %p2452_p1 }
  0x22   : > { %p2458_p8 = pnand %p2456_p7, %p2453_p3 }
  0x24   : > { %2461 = shalt.err (!%p2458_p8)
}
  0x25   : > { %s2462_s7 = scalar_lea.vmem %s165_s28, 8192  ;;  %s2469_s8 = scalar_lea.vmem %s165_s28, 16384 }
  0x26   : > { %p2463_p5 = scmp.ne.s32.totalorder %s165_s28, %s2462_s7  ;;  %p2470_p2 = scmp.lt.s32.totalorder %s165_s28, %s165_s28 }
  0x27   : > { %p2471_p11 = scmp.lt.s32.totalorder %s2469_s8, %s2462_s7 }
  0x28   : > { %p2465_p9 = pnand %p2463_p5, %p2451_p0 }
  0x29   : > { %p2472_p6 = por %p2471_p11, %p2470_p2 }
  0x2a   : > { %p2466_p10 = pneg %p2465_p9 }
  0x2c   : > { %p2473_p4 = pnand %p2472_p6, %p2466_p10 }
  0x2e   : > { %2476 = shalt.err (!%p2473_p4)
}
  0x2f   : > { %s5418_s14 = smov 128   ;;  %s5419_s19 = smov 8  }
  0x30   : > { %2282 = dma.hbm_to_vmem [thread:$0]  (!%p2768_p12), %s5452_s0, 8192, %s165_s28, [#allocation3], %s5418_s14, %s5418_s14, %s5419_s19  }
  0x31   : > { %p2240_p2 = scmp.ge.s32.totalorder %s2628_s18, 1  ;;  %p201_p4 = scmp.lt.s32.totalorder %s2628_s18, 3 }
  0x32   : > { %s2212_s30 = sshll.u32 %s2624_s17, 5  ;;  %s2219_s3 = sshll.u32 %s5551_s20, 5 }
  0x33   : > { %p2790_p6 = pnand %p2240_p2, %p201_p4  ;;  %s2213_s29 = sadd.s32 4294967295, %s2212_s30 }
  0x34   : > { %p68_p10 = scmp.gt.s32.totalorder %s2213_s29, 0  ;;  %p2214_p11 = scmp.lt.s32.totalorder %s2213_s29, 31 }
  0x35   : > { %s2220_s4 = sadd.s32 4294967295, %s2219_s3  ;;  %s83_s28 = sadd.s32 1, %s2608_s13 }
  0x36   : > { %s5553_s29 = smov (!%p68_p10, %s2213_s29), 0  ;;  %p74_p12 = scmp.gt.s32.totalorder %s2220_s4, 0 }
  0x37   : > { %p2221_p13 = scmp.lt.s32.totalorder %s2220_s4, 31  ;;  %s5555_s29 = smov (!%p2214_p11, %s5553_s29), 31 }
  0x38   : > { %s5557_s4 = smov (!%p74_p12, %s2220_s4), 0  ;;  %p90_p0 = scmp.ne.s32.totalorder %s2608_s13, %s2604_s12 }
  0x39   : > { %p96_p1 = scmp.ne.s32.totalorder %s2604_s12, %s2600_s11  ;;  %s5559_s4 = smov (!%p2221_p13, %s5557_s4), 31 }
  0x3a   : > { %p5454_p3 = scmp.eq.s32.totalorder %s2628_s18, 0  ;;  %p5455_p8 = scmp.ne.s32.totalorder %s5448_s21, 0 }
  0x3b   : > { %s79_s6 = ssub.s32 %s5555_s29, %s5559_s4  ;;  %s174_s7 = sand.u32 1, %s2608_s13  }
  0x3c   : > { %p92_p7 = por %p90_p0, %p5454_p3  ;;  %p2805_p5 = por %p96_p1, %p5455_p8 }
  0x3d   : > { %p81_p9 = scmp.eq.s32.totalorder %s79_s6, 0  ;;  %s2231_s8 = sshll.u32 %s174_s7, 4 }
  0x3e   : > { %s2239_s23 = sshll.u32 %s5555_s29, 7  ;;  %s178_s11 = scalar_lea.vmem [#allocation4], %s2231_s8 }
  0x3f   : > { %s2811_s24 = scalar_select %p81_p9, %s2608_s13, %s83_s28  }
  0x40   : > { %s192_s14 = scalar_lea.hbm %s5412_s1, %s2239_s23  ;;  %s193_s19 = sshll.u32 %s178_s11, 4  ;;  %s194_s19 = int_to_ptr.vmem [resolvable:$true] %s193_s19 }
  0x41   : > { %p5457_p2 = scmp.lt.s32.totalorder %s2628_s18, 2  ;;  %s175_s4 = scalar_lea.sflag [#allocation5], %s174_s7 }
  0x42   : > { %s2490_s6 = scalar_lea.vmem %s194_s19, 256  ;;  %s2665_s29 = smov [#allocation4]  }
  0x43   : > { %p2818_p4 = pnand %p5457_p2, %p92_p7  ;;  %p2491_p11 = scmp.ne.s32.totalorder %s194_s19, %s2490_s6 }
  0x44   : > { %s2495_s28 = sshll.u32 %s2665_s29, 4  ;;  %s2496_s28 = int_to_ptr.vmem [resolvable:$false] %s2495_s28 }
  0x45   : > { %p2479_p10 = pneg %p2818_p4  ;;  %s2497_s23 = scalar_lea.vmem %s2496_s28, 512 }
  0x46   : > { %p2498_p0 = scmp.lt.s32.totalorder %s194_s19, %s2496_s28  ;;  %p2499_p1 = scmp.lt.s32.totalorder %s2497_s23, %s2490_s6 }
  0x47   : > { %p2493_p12 = pnand %p2491_p11, %p2479_p10 }
  0x48   : > { %p2500_p3 = por %p2499_p1, %p2498_p0 }
  0x49   : > { %p2494_p13 = pneg %p2493_p12 }
  0x4b   : > { %p2501_p7 = pnand %p2500_p3, %p2494_p13 }
  0x4d   : > { %2504 = shalt.err (!%p2501_p7)
}
  0x4e   : > { %s2666_s8 = smov 4096   ;;  %s5459_s30 = smov 8  }
  0x4f   : > { %s5460_s7 = smov 128   ;;  %205 = sbr.rel (%p2790_p6) target bundleno = 879 (0x36f), region = 28 }
  0x50   : > { %2285 = dma.hbm_to_vmem [thread:$0]  (!%p2818_p4), %s192_s14, 256, %s194_s19, %s175_s4, %s2666_s8, %s5460_s7, %s5459_s30  }
  0x54   : > { %s207_s3 = sand.u32 1, %s2616_s15   ;;  %p5461_p8 = scmp.ne.s32.totalorder %s5449_s22, 0 }
  0x55   : > { %s2241_s11 = sshll.u32 %s207_s3, 9  ;;  %s208_s29 = scalar_lea.sflag [#allocation3], %s207_s3 }
  0x56   : > { %s2831_s0 = scalar_lea.vmem [#allocation2], %s2241_s11 }
  0x57   : > { %2582 = dma.done.wait (%p5461_p8), %s208_s29, 8192  }
  0x58   : > { %2584 = vsyncadd (%p5461_p8), %s208_s29, 4294959104  ;;  %s216_s21 = sand.u32 1, %s2604_s12  }
  0x59   : > { %s2838_s6 = sshll.u32 %s216_s21, 4  ;;  %s217_s14 = scalar_lea.sflag [#allocation5], %s216_s21 }
  0x5a   : > { %s220_s19 = scalar_lea.vmem [#allocation4], %s2838_s6 }
  0x5b   : > { %2586 = dma.done.wait (%p2805_p5), %s217_s14, 256  }
  0x5c   : > { %2588 = vsyncadd (%p2805_p5), %s217_s14, 4294967040  ;;  %v327_v0 = vlaneseq  ;;  %s2245_s27 = sshll.u32 %s2620_s16, 15  ;;  %v263_v15 = vld [vmem:[%s2831_s0] sm:$0xff]  ;;  %v264_v22 = vld [vmem:[%s2831_s0 + $0x8] sm:$0xff]  ;;  %s242_s5 = sand.u32 1, %s2592_s9  }
  0x5d   : > { %s427_s22 = ssub.s32 32768, %s2245_s27  ;;  %v279_v20 = vld [vmem:[%s2831_s0 + $0x80] sm:$0xff]  ;;  %v280_v29 = vld [vmem:[%s2831_s0 + $0x88] sm:$0xff]  ;;  %v265_v34 = vld [vmem:[%s2831_s0 + $0x10] sm:$0xff]  ;;  %s2243_s4 = sshll.u32 %s242_s5, 10 }
  0x5e   : > { %v2846_v1 = vshrl.u32 %v327_v0, 7  ;;  %v2848_v2 = vand.u32 127, %v327_v0  ;;  %v2856_v7 = vstv %s427_s22  ;;  %v281_v38 = vld [vmem:[%s2831_s0 + $0x90] sm:$0xff]  ;;  %v266_v44 = vld [vmem:[%s2831_s0 + $0x18] sm:$0xff]  ;;  %v267_v54 = vld [vmem:[%s2831_s0 + $0x20] sm:$0xff]  ;;  %s3350_s9 = scalar_lea.vmem [#allocation6], %s2243_s4  }
  0x5f   : > { %v282_v49 = vld [vmem:[%s2831_s0 + $0x98] sm:$0xff]  ;;  %v283_v59 = vld [vmem:[%s2831_s0 + $0xa0] sm:$0xff]  ;;  %v268_v0 = vld [vmem:[%s2831_s0 + $0x28] sm:$0xff]  ;;  %s2244_s28 = sshll.u32 %s2620_s16, 8  ;;  %p1040_p6 = scmp.gt.s32.totalorder %s2620_s16, 0 }
  0x60   : > { %5462 = vst [vmem:[#allocation9_spill] sm:$0xff] %v2848_v2  ;;  %v360_v3 = vmul.u32 128, %v2846_v1  ;;  %v344_v4 = vadd.s32 128, %v2846_v1  ;;  %v2853_v5 = vadd.s32 8, %v2846_v1  ;;  %v345_v6 = vadd.s32 136, %v2846_v1  ;;  %s2246_s23 = sadd.s32 4294967295, %s2244_s28 }
  0x61   : > { %v2859_v8 = vadd.s32 16, %v2846_v1  ;;  %v346_v9 = vadd.s32 144, %v2846_v1  ;;  %v2863_v10 = vadd.s32 24, %v2846_v1  ;;  %v347_v14 = vadd.s32 152, %v2846_v1  ;;  %s2247_s8 = sshll.u32 %s2246_s23, 7  ;;  %p5531_p5 = scmp.ne.s32.totalorder %s5450_s26, 0 }
  0x62   : > { %v2866_v11 = vadd.s32 %v2848_v2, %v360_v3  ;;  %v376_v12 = vmul.u32 128, %v344_v4  ;;  %v361_v13 = vmul.u32 128, %v2853_v5  ;;  %v2873_v18 = vadd.s32 32, %v2846_v1  ;;  %s1076_s30 = scalar_select %p1040_p6, 1, 0 }
  0x63   : > { %v377_v16 = vmul.u32 128, %v345_v6  ;;  %v362_v17 = vmul.u32 128, %v2859_v8  ;;  %v348_v19 = vadd.s32 160, %v2846_v1  ;;  %v2929_v41 = vadd.s32 40, %v2846_v1  ;;  %s2249_s7 = sshll.u32 (%p5531_p5), %s2620_s16, 1  ;;  %s2274_s3 = sshll.u32 (%p5531_p5), %s2620_s16, 4 }
  0x64   : > { %vm429_vm0 = vcmp.lt.s32.totalorder %v2866_v11, %v2856_v7  ;;  %v2880_v21 = vadd.s32 %v2848_v2, %v376_v12  ;;  %v2884_v23 = vadd.s32 %v2848_v2, %v361_v13  ;;  %v378_v24 = vmul.u32 128, %v346_v9  ;;  %v284_v12 = vld [vmem:[%s2831_s0 + $0xa8] sm:$0xff]  ;;  %s1463_s11 = ssub.s32 (%p5531_p5), 3, %s2249_s7  ;;  %s4493_s6 = scalar_lea.vmem (%p5531_p5), %s5413_s2, %s2274_s3  }
  0x65   : > { %v525_v25 = vsel %vm429_vm0, %v263_v15, 0.0  ;;  %v2890_v26 = vadd.s32 %v2848_v2, %v377_v16  ;;  %v2893_v27 = vadd.s32 %v2848_v2, %v362_v17  ;;  %v363_v28 = vmul.u32 128, %v2863_v10  ;;  %v269_v17 = vld [vmem:[%s2831_s0 + $0x30] sm:$0xff]  ;;  %p1464_p9 = scmp.lt.s32.totalorder (%p5531_p5), %s1463_s11, 2 }
  0x66   : > { %589 = vxpose.xlu0.b32.start [1/16] %v525_v25, 128  ;;  %vm445_vm1 = vcmp.lt.s32.totalorder %v2880_v21, %v2856_v7  ;;  %vm430_vm2 = vcmp.lt.s32.totalorder %v2884_v23, %v2856_v7  ;;  %v2902_v30 = vadd.s32 %v2848_v2, %v378_v24  ;;  %v379_v31 = vmul.u32 128, %v347_v14  ;;  %v285_v25 = vld [vmem:[%s2831_s0 + $0xb0] sm:$0xff] }
  0x67   : > { %v541_v32 = vsel %vm445_vm1, %v279_v20, 0.0  ;;  %v526_v33 = vsel %vm430_vm2, %v264_v22, 0.0  ;;  %vm446_vm3 = vcmp.lt.s32.totalorder %v2890_v26, %v2856_v7  ;;  %vm431_vm4 = vcmp.lt.s32.totalorder %v2893_v27, %v2856_v7 }
  0x68   : > { %621 = vxpose.xlu1.b32.start [1/16] %v541_v32, 128  ;;  %v2916_v35 = vadd.s32 %v2848_v2, %v363_v28  ;;  %v542_v36 = vsel %vm446_vm3, %v280_v29, 0.0  ;;  %vm447_vm5 = vcmp.lt.s32.totalorder %v2902_v30, %v2856_v7  ;;  %v364_v37 = vmul.u32 128, %v2873_v18 }
  0x69   : > { %v2926_v39 = vadd.s32 %v2848_v2, %v379_v31  ;;  %v380_v40 = vmul.u32 128, %v348_v19  ;;  %v349_v42 = vadd.s32 168, %v2846_v1  ;;  %v527_v43 = vsel %vm431_vm4, %v265_v34, 0.0 }
  0x6a   : > { %590 = vxpose.xlu0.b32.cont [2/16] %v526_v33, 128  ;;  %vm432_vm6 = vcmp.lt.s32.totalorder %v2916_v35, %v2856_v7  ;;  %v2939_v45 = vadd.s32 %v2848_v2, %v364_v37  ;;  %v365_v46 = vmul.u32 128, %v2929_v41  ;;  %v2943_v47 = vadd.s32 48, %v2846_v1  ;;  %v270_v33 = vld [vmem:[%s2831_s0 + $0x38] sm:$0xff] }
  0x6b   : > { %v543_v48 = vsel %vm447_vm5, %v281_v38, 0.0  ;;  %vm448_vm7 = vcmp.lt.s32.totalorder %v2926_v39, %v2856_v7  ;;  %v2952_v50 = vadd.s32 %v2848_v2, %v380_v40  ;;  %v381_v51 = vmul.u32 128, %v349_v42  ;;  %v286_v40 = vld [vmem:[%s2831_s0 + $0xb8] sm:$0xff] }
  0x6c   : > { %622 = vxpose.xlu1.b32.cont [2/16] %v542_v36, 128  ;;  %v350_v52 = vadd.s32 176, %v2846_v1  ;;  %v528_v53 = vsel %vm432_vm6, %v266_v44, 0.0  ;;  %vm433_vm8 = vcmp.lt.s32.totalorder %v2939_v45, %v2856_v7  ;;  %v2962_v55 = vadd.s32 %v2848_v2, %v365_v46 }
  0x6d   : > { %v366_v56 = vmul.u32 128, %v2943_v47  ;;  %v2966_v57 = vadd.s32 56, %v2846_v1  ;;  %v544_v58 = vsel %vm448_vm7, %v282_v49, 0.0  ;;  %vm449_vm9 = vcmp.lt.s32.totalorder %v2952_v50, %v2856_v7 }
  0x6e   : > { %591 = vxpose.xlu0.b32.cont [3/16] %v527_v43, 128  ;;  %v2975_v60 = vadd.s32 %v2848_v2, %v381_v51  ;;  %v382_v61 = vmul.u32 128, %v350_v52  ;;  %v351_v62 = vadd.s32 184, %v2846_v1  ;;  %v529_v63 = vsel %vm433_vm8, %v267_v54, 0.0  ;;  %v287_v54 = vld [vmem:[%s2831_s0 + $0xc0] sm:$0xff] }
  0x6f   : > { %vm434_vm10 = vcmp.lt.s32.totalorder %v2962_v55, %v2856_v7  ;;  %v2985_v3 = vadd.s32 %v2848_v2, %v366_v56  ;;  %v367_v4 = vmul.u32 128, %v2966_v57  ;;  %v2989_v6 = vadd.s32 64, %v2846_v1 }
  0x70   : > { %623 = vxpose.xlu1.b32.cont [3/16] %v543_v48, 128  ;;  %v545_v9 = vsel %vm449_vm9, %v283_v59, 0.0  ;;  %vm450_vm11 = vcmp.lt.s32.totalorder %v2975_v60, %v2856_v7  ;;  %v2998_v13 = vadd.s32 %v2848_v2, %v382_v61  ;;  %v383_v14 = vmul.u32 128, %v351_v62  ;;  %v271_v48 = vld [vmem:[%s2831_s0 + $0x40] sm:$0xff]  ;;  %v272_v62 = vld [vmem:[%s2831_s0 + $0x48] sm:$0xff] }
  0x71   : > { %v352_v15 = vadd.s32 192, %v2846_v1  ;;  %v530_v16 = vsel %vm434_vm10, %v268_v0, 0.0  ;;  %vm5434_vm12 = vcmp.lt.s32.totalorder %v2985_v3, %v2856_v7  ;;  %v3008_v19 = vadd.s32 %v2848_v2, %v367_v4 }
  0x72   : > { %592 = vxpose.xlu0.b32.cont [4/16] %v528_v53, 128  ;;  %v368_v20 = vmul.u32 128, %v2989_v6  ;;  %v3012_v22 = vadd.s32 72, %v2846_v1  ;;  %v546_v24 = vsel %vm450_vm11, %v284_v12, 0.0  ;;  %vm5420_vm13 = vcmp.lt.s32.totalorder %v2998_v13, %v2856_v7  ;;  %v288_v12 = vld [vmem:[%s2831_s0 + $0xc8] sm:$0xff] }
  0x73   : > { %v3021_v28 = vadd.s32 %v2848_v2, %v383_v14  ;;  %v384_v29 = vmul.u32 128, %v352_v15  ;;  %v353_v31 = vadd.s32 200, %v2846_v1  ;;  %v531_v32 = vsel %vm5434_vm12, %v269_v17, 0.0 }
  0x74   : > { %624 = vxpose.xlu1.b32.cont [4/16] %v544_v58, 128  ;;  %vm5421_vm14 = vcmp.lt.s32.totalorder %v3008_v19, %v2856_v7  ;;  %v3031_v34 = vadd.s32 %v2848_v2, %v368_v20  ;;  %v369_v36 = vmul.u32 128, %v3012_v22  ;;  %v3035_v37 = vadd.s32 80, %v2846_v1  ;;  %v273_v20 = vld [vmem:[%s2831_s0 + $0x50] sm:$0xff] }
  0x75   : > { %v547_v38 = vsel %vm5420_vm13, %v285_v25, 0.0  ;;  %vm5422_vm15 = vcmp.lt.s32.totalorder %v3021_v28, %v2856_v7  ;;  %v3044_v42 = vadd.s32 %v2848_v2, %v384_v29  ;;  %v385_v43 = vmul.u32 128, %v353_v31 }
  0x76   : > { %593 = vxpose.xlu0.b32.cont [5/16] %v529_v63, 128  ;;  %5463 = vst [vmem:[#allocation10_spill] sm:$0xff] %v3035_v37  ;;  %v354_v44 = vadd.s32 208, %v2846_v1  ;;  %v532_v46 = vsel %vm5421_vm14, %v270_v33, 0.0  ;;  %vm5423_vm13 = vcmp.lt.s32.totalorder %v3031_v34, %v2856_v7  ;;  %v3054_v49 = vadd.s32 %v2848_v2, %v369_v36 }
  0x77   : > { %v370_v51 = vmul.u32 128, %v3035_v37  ;;  %v3058_v52 = vadd.s32 88, %v2846_v1  ;;  %v548_v53 = vsel %vm5422_vm15, %v286_v40, 0.0  ;;  %vm5424_vm14 = vcmp.lt.s32.totalorder %v3044_v42, %v2856_v7 }
  0x78   : > { %625 = vxpose.xlu1.b32.cont [5/16] %v545_v9, 128  ;;  %v3067_v56 = vadd.s32 %v2848_v2, %v385_v43  ;;  %v386_v58 = vmul.u32 128, %v354_v44  ;;  %v355_v59 = vadd.s32 216, %v2846_v1  ;;  %v533_v61 = vsel %vm5423_vm13, %v271_v48, 0.0  ;;  %v274_v43 = vld [vmem:[%s2831_s0 + $0x58] sm:$0xff] }
  0x79   : > { %5464 = vst [vmem:[#allocation11_spill] sm:$0xff] %v3058_v52  ;;  %vm5425_vm15 = vcmp.lt.s32.totalorder %v3054_v49, %v2856_v7  ;;  %v3077_v63 = vadd.s32 %v2848_v2, %v370_v51  ;;  %v371_v0 = vmul.u32 128, %v3058_v52  ;;  %v3081_v4 = vadd.s32 96, %v2846_v1 }
  0x7a   : > { %594 = vxpose.xlu0.b32.cont [6/16] %v530_v16, 128  ;;  %v549_v9 = vsel %vm5424_vm14, %v287_v54, 0.0  ;;  %vm5426_vm13 = vcmp.lt.s32.totalorder %v3067_v56, %v2856_v7  ;;  %v3090_v14 = vadd.s32 %v2848_v2, %v386_v58  ;;  %v387_v15 = vmul.u32 128, %v355_v59 }
  0x7b   : > { %5465 = vst [vmem:[#allocation12_spill] sm:$0xff] %v3081_v4  ;;  %v356_v16 = vadd.s32 224, %v2846_v1  ;;  %v534_v17 = vsel %vm5425_vm15, %v272_v62, 0.0  ;;  %vm5427_vm14 = vcmp.lt.s32.totalorder %v3077_v63, %v2856_v7  ;;  %v372_v25 = vmul.u32 128, %v3081_v4  ;;  %v275_v62 = vld [vmem:[%s2831_s0 + $0x60] sm:$0xff] }
  0x7c   : > { %626 = vxpose.xlu1.b32.cont [6/16] %v546_v24, 128  ;;  %v3100_v24 = vadd.s32 %v2848_v2, %v371_v0  ;;  %v3104_v29 = vadd.s32 104, %v2846_v1  ;;  %v550_v31 = vsel %vm5426_vm13, %v288_v12, 0.0  ;;  %vm5428_vm15 = vcmp.lt.s32.totalorder %v3090_v14, %v2856_v7 }
  0x7d   : > { %v3113_v33 = vadd.s32 %v2848_v2, %v387_v15  ;;  %v388_v36 = vmul.u32 128, %v356_v16  ;;  %v535_v40 = vsel %vm5427_vm14, %v273_v20, 0.0  ;;  %v3123_v44 = vadd.s32 %v2848_v2, %v372_v25  ;;  %v291_v16 = vld [vmem:[%s2831_s0 + $0xe0] sm:$0xff] }
  0x7e   : > { %595 = vxpose.xlu0.b32.cont [7/16] %v531_v32, 128  ;;  %5466 = vst [vmem:[#allocation13_spill] sm:$0xff] %v3104_v29  ;;  %v289_v32 = vld [vmem:[%s2831_s0 + $0xd0] sm:$0xff]  ;;  %vm5429_vm13 = vcmp.lt.s32.totalorder %v3100_v24, %v2856_v7  ;;  %v3127_v48 = vadd.s32 112, %v2846_v1  ;;  %v358_v59 = vadd.s32 240, %v2846_v1  ;;  %v3150_v12 = vadd.s32 120, %v2846_v1 }
  0x7f   : > { %v551_v51 = vsel %vm5428_vm15, %v289_v32, 0.0  ;;  %vm5430_vm14 = vcmp.lt.s32.totalorder %v3113_v33, %v2856_v7  ;;  %v3136_v54 = vadd.s32 %v2848_v2, %v388_v36  ;;  %vm5431_vm15 = vcmp.lt.s32.totalorder %v3123_v44, %v2856_v7  ;;  %v276_v32 = vld [vmem:[%s2831_s0 + $0x68] sm:$0xff] }
  0x80   : > { %627 = vxpose.xlu1.b32.cont [7/16] %v547_v38, 128  ;;  %v357_v38 = vadd.s32 232, %v2846_v1  ;;  %5467 = vst [vmem:[#allocation14_spill] sm:$0xff] %v3127_v48  ;;  %5468 = vst [vmem:[#allocation15_spill] sm:$0xff] %v3150_v12  ;;  %v390_v20 = vmul.u32 128, %v358_v59  ;;  %v359_v25 = vadd.s32 248, %v2846_v1 }
  0x82   : > { %596 = vxpose.xlu0.b32.cont [8/16] %v532_v46, 128  ;;  %v373_v46 = vmul.u32 128, %v3104_v29  ;;  %v389_v58 = vmul.u32 128, %v357_v38  ;;  %v2668_v29 = vmov 7  }
  0x83   : > { %v375_v38 = vmul.u32 128, %v3150_v12 }
  0x84   : > { %628 = vxpose.xlu1.b32.cont [8/16] %v548_v53, 128  ;;  %v290_v53 = vld [vmem:[%s2831_s0 + $0xd8] sm:$0xff]  ;;  %v3146_v0 = vadd.s32 %v2848_v2, %v373_v46  ;;  %v3179_v46 = vadd.s32 %v2848_v2, %v390_v20 }
  0x85   : > { %v552_v15 = vsel %vm5430_vm14, %v290_v53, 0.0  ;;  %v3188_v59 = vadd.s32 %v2848_v2, %v375_v38 }
  0x86   : > { %597 = vxpose.xlu0.b32.cont [9/16] %v533_v61, 128  ;;  %v536_v61 = vsel %vm5429_vm13, %v274_v43, 0.0  ;;  %vm5432_vm13 = vcmp.lt.s32.totalorder %v3136_v54, %v2856_v7  ;;  %vm5433_vm14 = vcmp.lt.s32.totalorder %v3146_v0, %v2856_v7  ;;  %v292_v43 = vld [vmem:[%s2831_s0 + $0xe8] sm:$0xff] }
  0x87   : > { %v538_v53 = vsel %vm5433_vm14, %v276_v32, 0.0  ;;  %vm459_vm14 = vcmp.lt.s32.totalorder %v3179_v46, %v2856_v7  ;;  %vm444_vm12 = vcmp.lt.s32.totalorder %v3188_v59, %v2856_v7  ;;  %v295_v32 = vld [vmem:[%s2831_s0 + $0x100] sm:$0xff] }
  0x88   : > { %629 = vxpose.xlu1.b32.cont [9/16] %v549_v9, 128  ;;  %v374_v9 = vmul.u32 128, %v3127_v48 }
  0x8a   : > { %598 = vxpose.xlu0.b32.cont [10/16] %v534_v17, 128  ;;  %v3159_v17 = vadd.s32 %v2848_v2, %v389_v58  ;;  %v3169_v36 = vadd.s32 %v2848_v2, %v374_v9  ;;  %v277_v58 = vld [vmem:[%s2831_s0 + $0x70] sm:$0xff] }
  0x8c   : > { %630 = vxpose.xlu1.b32.cont [10/16] %v550_v31, 128  ;;  %v537_v31 = vsel %vm5431_vm15, %v275_v62, 0.0  ;;  %vm5435_vm15 = vcmp.lt.s32.totalorder %v3159_v17, %v2856_v7  ;;  %v293_v62 = vld [vmem:[%s2831_s0 + $0xf0] sm:$0xff] }
  0x8d   : > { %v555_v20 = vsel %vm459_vm14, %v293_v62, 0.0  ;;  %v297_v62 = vld [vmem:[%s2831_s0 + $0x110] sm:$0xff] }
  0x8e   : > { %599 = vxpose.xlu0.b32.cont [11/16] %v535_v40, 128  ;;  %v553_v40 = vsel %vm5432_vm13, %v291_v16, 0.0  ;;  %vm443_vm13 = vcmp.lt.s32.totalorder %v3169_v36, %v2856_v7  ;;  %v278_v16 = vld [vmem:[%s2831_s0 + $0x78] sm:$0xff]  ;;  %v559_v21 = vsel %vm431_vm4, %v297_v62, 0.0  ;;  %vm5473_vm4 = vcmp.lt.s32.totalorder %v3031_v34, %v2856_v7  ;;  %v304_v62 = vld [vmem:[%s2831_s0 + $0x148] sm:$0xff] }
  0x90   : > { %631 = vxpose.xlu1.b32.cont [11/16] %v551_v51, 128  ;;  %v391_v51 = vmul.u32 128, %v359_v25  ;;  %v294_v25 = vld [vmem:[%s2831_s0 + $0xf8] sm:$0xff] }
  0x92   : > { %600 = vxpose.xlu0.b32.cont [12/16] %v536_v61, 128  ;;  %v554_v61 = vsel %vm5435_vm15, %v292_v43, 0.0  ;;  %v3197_v9 = vadd.s32 %v2848_v2, %v391_v51  ;;  %v557_v43 = vsel %vm429_vm0, %v295_v32, 0.0  ;;  %v296_v51 = vld [vmem:[%s2831_s0 + $0x108] sm:$0xff]  ;;  %vm5469_vm0 = vcmp.lt.s32.totalorder %v2985_v3, %v2856_v7 }
  0x93   : > { %v300_v32 = vld [vmem:[%s2831_s0 + $0x128] sm:$0xff] }
  0x94   : > { %632 = vxpose.xlu1.b32.cont [12/16] %v552_v15, 128  ;;  %v539_v15 = vsel %vm443_vm13, %v277_v58, 0.0  ;;  %vm460_vm15 = vcmp.lt.s32.totalorder %v3197_v9, %v2856_v7  ;;  %v312_v58 = vld [vmem:[%s2831_s0 + $0x188] sm:$0xff]  ;;  %v562_v39 = vsel %vm434_vm10, %v300_v32, 0.0  ;;  %vm5479_vm10 = vcmp.lt.s32.totalorder %v3100_v24, %v2856_v7  ;;  %v310_v32 = vld [vmem:[%s2831_s0 + $0x178] sm:$0xff] }
  0x95   : > { %v556_v38 = vsel %vm460_vm15, %v294_v25, 0.0  ;;  %v574_v11 = vsel %vm446_vm3, %v312_v58, 0.0  ;;  %v299_v25 = vld [vmem:[%s2831_s0 + $0x120] sm:$0xff]  ;;  %vm5472_vm3 = vcmp.lt.s32.totalorder %v3021_v28, %v2856_v7 }
  0x96   : > { %601 = vxpose.xlu0.b32.cont [13/16] %v537_v31, 128  ;;  %v540_v31 = vsel %vm444_vm12, %v278_v16, 0.0  ;;  %v298_v16 = vld [vmem:[%s2831_s0 + $0x118] sm:$0xff]  ;;  %v561_v30 = vsel %vm433_vm8, %v299_v25, 0.0  ;;  %v303_v58 = vld [vmem:[%s2831_s0 + $0x140] sm:$0xff]  ;;  %vm5477_vm8 = vcmp.lt.s32.totalorder %v3077_v63, %v2856_v7  ;;  %v308_v25 = vld [vmem:[%s2831_s0 + $0x168] sm:$0xff] }
  0x97   : > { %v560_v26 = vsel %vm432_vm6, %v298_v16, 0.0  ;;  %vm5475_vm6 = vcmp.lt.s32.totalorder %v3054_v49, %v2856_v7  ;;  %v306_v16 = vld [vmem:[%s2831_s0 + $0x158] sm:$0xff] }
  0x98   : > { %633 = vxpose.xlu1.b32.cont [13/16] %v553_v40, 128  ;;  %v311_v40 = vld [vmem:[%s2831_s0 + $0x180] sm:$0xff]  ;;  %v566_v28 = vsel %vm5475_vm6, %v304_v62, 0.0 }
  0x9a   : > { %602 = vxpose.xlu0.b32.cont [14/16] %v538_v53, 128  ;;  %v573_v53 = vsel %vm445_vm1, %v311_v40, 0.0  ;;  %v301_v40 = vld [vmem:[%s2831_s0 + $0x130] sm:$0xff]  ;;  %vm5470_vm1 = vcmp.lt.s32.totalorder %v2998_v13, %v2856_v7  ;;  %v565_v13 = vsel %vm5473_vm4, %v303_v58, 0.0 }
  0x9b   : > { %v563_v50 = vsel %vm5469_vm0, %v301_v40, 0.0  ;;  %vm5481_vm0 = vcmp.lt.s32.totalorder %v3123_v44, %v2856_v7 }
  0x9c   : > { %634 = vxpose.xlu1.b32.cont [14/16] %v554_v61, 128  ;;  %v558_v61 = vsel %vm430_vm2, %v296_v51, 0.0  ;;  %v302_v51 = vld [vmem:[%s2831_s0 + $0x138] sm:$0xff]  ;;  %vm5471_vm2 = vcmp.lt.s32.totalorder %v3008_v19, %v2856_v7 }
  0x9d   : > { %v564_v60 = vsel %vm5471_vm2, %v302_v51, 0.0  ;;  %vm5483_vm2 = vcmp.lt.s32.totalorder %v3146_v0, %v2856_v7 }
  0x9e   : > { %603 = vxpose.xlu0.b32.cont [15/16] %v539_v15, 128  ;;  %v313_v15 = vld [vmem:[%s2831_s0 + $0x190] sm:$0xff] }
  0x9f   : > { %v575_v23 = vsel %vm447_vm5, %v313_v15, 0.0  ;;  %vm5474_vm5 = vcmp.lt.s32.totalorder %v3044_v42, %v2856_v7  ;;  %v305_v15 = vld [vmem:[%s2831_s0 + $0x150] sm:$0xff] }
  0xa0   : > { %635 = vxpose.xlu1.b32.cont [15/16] %v555_v20, 128  ;;  %v314_v20 = vld [vmem:[%s2831_s0 + $0x198] sm:$0xff]  ;;  %v567_v42 = vsel %vm5477_vm8, %v305_v15, 0.0 }
  0xa1   : > { %v576_v27 = vsel %vm448_vm7, %v314_v20, 0.0  ;;  %vm5476_vm7 = vcmp.lt.s32.totalorder %v3067_v56, %v2856_v7  ;;  %v568_v56 = vsel %vm5479_vm10, %v306_v16, 0.0  ;;  %v307_v20 = vld [vmem:[%s2831_s0 + $0x160] sm:$0xff] }
  0xa2   : > { %604 = vxpose.xlu0.b32.end [16/16] %v540_v31, 128  ;;  %v315_v31 = vld [vmem:[%s2831_s0 + $0x1a0] sm:$0xff] }
  0xa3   : > { %v577_v35 = vsel %vm449_vm9, %v315_v31, 0.0  ;;  %vm5478_vm9 = vcmp.lt.s32.totalorder %v3090_v14, %v2856_v7  ;;  %v569_v14 = vsel %vm5481_vm0, %v307_v20, 0.0  ;;  %v309_v31 = vld [vmem:[%s2831_s0 + $0x170] sm:$0xff] }
  0xa4   : > { %636 = vxpose.xlu1.b32.end [16/16] %v556_v38, 128  ;;  %v316_v38 = vld [vmem:[%s2831_s0 + $0x1a8] sm:$0xff] }
  0xa5   : > { %v578_v45 = vsel %vm450_vm11, %v316_v38, 0.0  ;;  %vm5480_vm11 = vcmp.lt.s32.totalorder %v3113_v33, %v2856_v7  ;;  %v570_v33 = vsel %vm5483_vm2, %v308_v25, 0.0 }
  0xa6   : > { %653 = vxpose.xlu0.b32.start [1/16] %v557_v43, 128  ;;  %v317_v43 = vld [vmem:[%s2831_s0 + $0x1b0] sm:$0xff] }
  0xa7   : > { %v579_v55 = vsel %vm5470_vm1, %v317_v43, 0.0  ;;  %vm5482_vm1 = vcmp.lt.s32.totalorder %v3136_v54, %v2856_v7  ;;  %v571_v54 = vsel %vm443_vm13, %v309_v31, 0.0 }
  0xa8   : > { %685 = vxpose.xlu1.b32.start [1/16] %v573_v53, 128  ;;  %v318_v53 = vld [vmem:[%s2831_s0 + $0x1b8] sm:$0xff] }
  0xa9   : > { %v580_v3 = vsel %vm5472_vm3, %v318_v53, 0.0  ;;  %vm5484_vm3 = vcmp.lt.s32.totalorder %v3159_v17, %v2856_v7  ;;  %v572_v17 = vsel %vm444_vm12, %v310_v32, 0.0  ;;  %v974_v7 = vld [vmem:[%s220_s19] sm:$0xff] }
  0xaa   : > { %654 = vxpose.xlu0.b32.cont [2/16] %v558_v61, 128  ;;  %v319_v61 = vld [vmem:[%s2831_s0 + $0x1c0] sm:$0xff] }
  0xab   : > { %v581_v19 = vsel %vm5474_vm5, %v319_v61, 0.0 }
  0xac   : > { %686 = vxpose.xlu1.b32.cont [2/16] %v574_v11, 128  ;;  %v320_v11 = vld [vmem:[%s2831_s0 + $0x1c8] sm:$0xff] }
  0xad   : > { %v582_v34 = vsel %vm5476_vm7, %v320_v11, 0.0 }
  0xae   : > { %655 = vxpose.xlu0.b32.cont [3/16] %v559_v21, 128  ;;  %v321_v21 = vld [vmem:[%s2831_s0 + $0x1d0] sm:$0xff] }
  0xaf   : > { %v583_v49 = vsel %vm5478_vm9, %v321_v21, 0.0 }
  0xb0   : > { %687 = vxpose.xlu1.b32.cont [3/16] %v575_v23, 128  ;;  %v322_v23 = vld [vmem:[%s2831_s0 + $0x1d8] sm:$0xff] }
  0xb1   : > { %v584_v63 = vsel %vm5480_vm11, %v322_v23, 0.0 }
  0xb2   : > { %656 = vxpose.xlu0.b32.cont [4/16] %v560_v26, 128  ;;  %v323_v26 = vld [vmem:[%s2831_s0 + $0x1e0] sm:$0xff] }
  0xb3   : > { %v585_v24 = vsel %vm5482_vm1, %v323_v26, 0.0 }
  0xb4   : > { %688 = vxpose.xlu1.b32.cont [4/16] %v576_v27, 128  ;;  %v324_v27 = vld [vmem:[%s2831_s0 + $0x1e8] sm:$0xff] }
  0xb5   : > { %v586_v44 = vsel %vm5484_vm3, %v324_v27, 0.0 }
  0xb6   : > { %657 = vxpose.xlu0.b32.cont [5/16] %v561_v30, 128  ;;  %v325_v30 = vld [vmem:[%s2831_s0 + $0x1f0] sm:$0xff] }
  0xb7   : > { %v587_v0 = vsel %vm459_vm14, %v325_v30, 0.0 }
  0xb8   : > { %689 = vxpose.xlu1.b32.cont [5/16] %v577_v35, 128  ;;  %v326_v35 = vld [vmem:[%s2831_s0 + $0x1f8] sm:$0xff]  ;;  %s2667_s0 = smov 1  }
  0xb9   : > { %v588_v36 = vsel %vm460_vm15, %v326_v35, 0.0 }
  0xba   : > { %658 = vxpose.xlu0.b32.cont [6/16] %v562_v39, 128  ;;  %v975_v39 = vld [vmem:[%s220_s19 + $0x8] sm:$0xff] }
  0xbc   : > { %690 = vxpose.xlu1.b32.cont [6/16] %v578_v45, 128 }
  0xbe   : > { %659 = vxpose.xlu0.b32.cont [7/16] %v563_v50, 128 }
  0xc0   : > { %691 = vxpose.xlu1.b32.cont [7/16] %v579_v55, 128 }
  0xc2   : > { %660 = vxpose.xlu0.b32.cont [8/16] %v564_v60, 128 }
  0xc4   : > { %692 = vxpose.xlu1.b32.cont [8/16] %v580_v3, 128 }
  0xc6   : > { %661 = vxpose.xlu0.b32.cont [9/16] %v565_v13, 128 }
  0xc8   : > { %693 = vxpose.xlu1.b32.cont [9/16] %v581_v19, 128 }
  0xca   : > { %662 = vxpose.xlu0.b32.cont [10/16] %v566_v28, 128 }
  0xcc   : > { %694 = vxpose.xlu1.b32.cont [10/16] %v582_v34, 128 }
  0xce   : > { %663 = vxpose.xlu0.b32.cont [11/16] %v567_v42, 128 }
  0xd0   : > { %695 = vxpose.xlu1.b32.cont [11/16] %v583_v49, 128 }
  0xd2   : > { %664 = vxpose.xlu0.b32.cont [12/16] %v568_v56, 128 }
  0xd4   : > { %696 = vxpose.xlu1.b32.cont [12/16] %v584_v63, 128 }
  0xd6   : > { %665 = vxpose.xlu0.b32.cont [13/16] %v569_v14, 128 }
  0xd8   : > { %697 = vxpose.xlu1.b32.cont [13/16] %v585_v24, 128 }
  0xda   : > { %666 = vxpose.xlu0.b32.cont [14/16] %v570_v33, 128 }
  0xdc   : > { %698 = vxpose.xlu1.b32.cont [14/16] %v586_v44, 128 }
  0xde   : > { %667 = vxpose.xlu0.b32.cont [15/16] %v571_v54, 128 }
  0xe0   : > { %699 = vxpose.xlu1.b32.cont [15/16] %v587_v0, 128 }
  0xe2   : > { %668 = vxpose.xlu0.b32.end [16/16] %v572_v17, 128  ;;  %v3346_v38 = vpop.trf.xlu0 }
  0xe3   : > { %717 = vst [vmem:[%s3350_s9 + $0x100] sm:$0xff] %v3346_v38 }
  0xe4   : > { %700 = vxpose.xlu1.b32.end [16/16] %v588_v36, 128  ;;  %v3354_v46 = vpop.trf.xlu1 }
  0xe5   : > { %718 = vst [vmem:[%s3350_s9 + $0x108] sm:$0xff] %v3354_v46 }
  0xe6   : > { %1008 = vxpose.xlu0.b32.start.end [1/1] (short) %v975_v39, 128  ;;  %v3360_v59 = vpop.trf.xlu0 }
  0xe7   : > { %719 = vst [vmem:[%s3350_s9 + $0x110] sm:$0xff] %v3360_v59 }
  0xe8   : > { %976 = vxpose.xlu1.b32.start.end [1/1] (short) %v974_v7, 128  ;;  %v3364_v9 = vpop.trf.xlu1 }
  0xe9   : > { %720 = vst [vmem:[%s3350_s9 + $0x118] sm:$0xff] %v3364_v9 }
  0xea   : > { %v3368_v40 = vpop.trf.xlu0 }
  0xeb   : > { %721 = vst [vmem:[%s3350_s9 + $0x120] sm:$0xff] %v3368_v40 }
  0xec   : > { %v3372_v45 = vpop.trf.xlu1 }
  0xed   : > { %722 = vst [vmem:[%s3350_s9 + $0x128] sm:$0xff] %v3372_v45 }
  0xee   : > { %v3376_v43 = vpop.trf.xlu0 }
  0xef   : > { %723 = vst [vmem:[%s3350_s9 + $0x130] sm:$0xff] %v3376_v43 }
  0xf0   : > { %v3380_v50 = vpop.trf.xlu1 }
  0xf1   : > { %724 = vst [vmem:[%s3350_s9 + $0x138] sm:$0xff] %v3380_v50 }
  0xf2   : > { %v3384_v51 = vpop.trf.xlu0 }
  0xf3   : > { %725 = vst [vmem:[%s3350_s9 + $0x140] sm:$0xff] %v3384_v51 }
  0xf4   : > { %v3388_v55 = vpop.trf.xlu1 }
  0xf5   : > { %726 = vst [vmem:[%s3350_s9 + $0x148] sm:$0xff] %v3388_v55 }
  0xf6   : > { %v3392_v53 = vpop.trf.xlu0 }
  0xf7   : > { %727 = vst [vmem:[%s3350_s9 + $0x150] sm:$0xff] %v3392_v53 }
  0xf8   : > { %v3396_v60 = vpop.trf.xlu1 }
  0xf9   : > { %728 = vst [vmem:[%s3350_s9 + $0x158] sm:$0xff] %v3396_v60 }
  0xfa   : > { %v3400_v58 = vpop.trf.xlu0 }
  0xfb   : > { %729 = vst [vmem:[%s3350_s9 + $0x160] sm:$0xff] %v3400_v58 }
  0xfc   : > { %v3404_v3 = vpop.trf.xlu1 }
  0xfd   : > { %730 = vst [vmem:[%s3350_s9 + $0x168] sm:$0xff] %v3404_v3 }
  0xfe   : > { %v3408_v61 = vpop.trf.xlu0 }
  0xff   : > { %731 = vst [vmem:[%s3350_s9 + $0x170] sm:$0xff] %v3408_v61 }
 0x100   : > { %v3412_v13 = vpop.trf.xlu1 }
 0x101   : > { %732 = vst [vmem:[%s3350_s9 + $0x178] sm:$0xff] %v3412_v13 }
 0x102   : > { %v3416_v62 = vpop.trf.xlu0 }
 0x103   : > { %733 = vst [vmem:[%s3350_s9 + $0x180] sm:$0xff] %v3416_v62 }
 0x104   : > { %v3420_v19 = vpop.trf.xlu1 }
 0x105   : > { %734 = vst [vmem:[%s3350_s9 + $0x188] sm:$0xff] %v3420_v19 }
 0x106   : > { %v3424_v11 = vpop.trf.xlu0  ;;  %2448 = vset.pattern.permute.xlu1 %v2668_v29 }
 0x107   : > { %735 = vst [vmem:[%s3350_s9 + $0x190] sm:$0xff] %v3424_v11 }
 0x108   : > { %v3428_v28 = vpop.trf.xlu1 }
 0x109   : > { %736 = vst [vmem:[%s3350_s9 + $0x198] sm:$0xff] %v3428_v28 }
 0x10a   : > { %v3432_v15 = vpop.trf.xlu0 }
 0x10b   : > { %737 = vst [vmem:[%s3350_s9 + $0x1a0] sm:$0xff] %v3432_v15 }
 0x10c   : > { %v3436_v34 = vpop.trf.xlu1 }
 0x10d   : > { %738 = vst [vmem:[%s3350_s9 + $0x1a8] sm:$0xff] %v3436_v34 }
 0x10e   : > { %v3440_v21 = vpop.trf.xlu0 }
 0x10f   : > { %739 = vst [vmem:[%s3350_s9 + $0x1b0] sm:$0xff] %v3440_v21  ;;  %2447 = vset.pattern.permute.xlu0 %v2668_v29 }
 0x110   : > { %v3444_v42 = vpop.trf.xlu1 }
 0x111   : > { %740 = vst [vmem:[%s3350_s9 + $0x1b8] sm:$0xff] %v3444_v42 }
 0x112   : > { %v3448_v16 = vpop.trf.xlu0 }
 0x113   : > { %741 = vst [vmem:[%s3350_s9 + $0x1c0] sm:$0xff] %v3448_v16 }
 0x114   : > { %v3452_v49 = vpop.trf.xlu1 }
 0x115   : > { %742 = vst [vmem:[%s3350_s9 + $0x1c8] sm:$0xff] %v3452_v49 }
 0x116   : > { %v3456_v23 = vpop.trf.xlu0 }
 0x117   : > { %743 = vst [vmem:[%s3350_s9 + $0x1d0] sm:$0xff] %v3456_v23 }
 0x118   : > { %v3460_v56 = vpop.trf.xlu1 }
 0x119   : > { %744 = vst [vmem:[%s3350_s9 + $0x1d8] sm:$0xff] %v3460_v56 }
 0x11a   : > { %v3464_v20 = vpop.trf.xlu0 }
 0x11b   : > { %745 = vst [vmem:[%s3350_s9 + $0x1e0] sm:$0xff] %v3464_v20 }
 0x11c   : > { %v3468_v63 = vpop.trf.xlu1 }
 0x11d   : > { %746 = vst [vmem:[%s3350_s9 + $0x1e8] sm:$0xff] %v3468_v63 }
 0x11e   : > { %v3472_v26 = vpop.trf.xlu0 }
 0x11f   : > { %747 = vst [vmem:[%s3350_s9 + $0x1f0] sm:$0xff] %v3472_v26 }
 0x120   : > { %v3476_v14 = vpop.trf.xlu1 }
 0x121   : > { %748 = vst [vmem:[%s3350_s9 + $0x1f8] sm:$0xff] %v3476_v14 }
 0x122   : > { %v3480_v25 = vpop.trf.xlu0 }
 0x123   : > { %749 = vst [vmem:[%s3350_s9 + $0x300] sm:$0xff] %v3480_v25 }
 0x124   : > { %v3484_v24 = vpop.trf.xlu1 }
 0x125   : > { %750 = vst [vmem:[%s3350_s9 + $0x308] sm:$0xff] %v3484_v24 }
 0x126   : > { %v3488_v27 = vpop.trf.xlu0 }
 0x127   : > { %751 = vst [vmem:[%s3350_s9 + $0x310] sm:$0xff] %v3488_v27 }
 0x128   : > { %v3492_v33 = vpop.trf.xlu1 }
 0x129   : > { %752 = vst [vmem:[%s3350_s9 + $0x318] sm:$0xff] %v3492_v33 }
 0x12a   : > { %v3496_v31 = vpop.trf.xlu0 }
 0x12b   : > { %753 = vst [vmem:[%s3350_s9 + $0x320] sm:$0xff] %v3496_v31 }
 0x12c   : > { %v3500_v44 = vpop.trf.xlu1 }
 0x12d   : > { %754 = vst [vmem:[%s3350_s9 + $0x328] sm:$0xff] %v3500_v44 }
 0x12e   : > { %v3504_v30 = vpop.trf.xlu0 }
 0x12f   : > { %755 = vst [vmem:[%s3350_s9 + $0x330] sm:$0xff] %v3504_v30 }
 0x130   : > { %v3508_v54 = vpop.trf.xlu1 }
 0x131   : > { %756 = vst [vmem:[%s3350_s9 + $0x338] sm:$0xff] %v3508_v54 }
 0x132   : > { %v3512_v32 = vpop.trf.xlu0 }
 0x133   : > { %757 = vst [vmem:[%s3350_s9 + $0x340] sm:$0xff] %v3512_v32 }
 0x134   : > { %v3516_v0 = vpop.trf.xlu1 }
 0x135   : > { %758 = vst [vmem:[%s3350_s9 + $0x348] sm:$0xff] %v3516_v0 }
 0x136   : > { %v3520_v35 = vpop.trf.xlu0 }
 0x137   : > { %759 = vst [vmem:[%s3350_s9 + $0x350] sm:$0xff] %v3520_v35 }
 0x138   : > { %v3524_v17 = vpop.trf.xlu1 }
 0x139   : > { %760 = vst [vmem:[%s3350_s9 + $0x358] sm:$0xff] %v3524_v17 }
 0x13a   : > { %v3528_v36 = vpop.trf.xlu0 }
 0x13b   : > { %761 = vst [vmem:[%s3350_s9 + $0x360] sm:$0xff] %v3528_v36 }
 0x13c   : > { %v3532_v39 = vpop.trf.xlu1 }
 0x13d   : > { %762 = vst [vmem:[%s3350_s9 + $0x368] sm:$0xff] %v3532_v39 }
 0x13e   : > { %v3536_v7 = vpop.trf.xlu0 }
 0x13f   : > { %763 = vst [vmem:[%s3350_s9 + $0x370] sm:$0xff] %v3536_v7 }
 0x140   : > { %v3540_v2 = vpop.trf.xlu1 }
 0x141   : > { %764 = vst [vmem:[%s3350_s9 + $0x378] sm:$0xff] %v3540_v2 }
 0x142   : > { %783 = vrot.lane.b32.xlu1 %v3360_v59, %s2667_s0  ;;  %v3546_v12 = vpop.trf.xlu0 }
 0x143   : > { %765 = vst [vmem:[%s3350_s9 + $0x380] sm:$0xff] %v3546_v12 }
 0x144   : > { %v3550_v48 = vpop.trf.xlu1 }
 0x145   : > { %766 = vst [vmem:[%s3350_s9 + $0x388] sm:$0xff] %v3550_v48 }
 0x146   : > { %785 = vrot.lane.b32.xlu1 %v3368_v40, %s2667_s0  ;;  %v678_v4 = vpop.trf.xlu0 }
 0x147   : > { %767 = vst [vmem:[%s3350_s9 + $0x390] sm:$0xff] %v678_v4 }
 0x148   : > { %v3557_v59 = vpop.trf.xlu1 }
 0x149   : > { %768 = vst [vmem:[%s3350_s9 + $0x398] sm:$0xff] %v3557_v59 }
 0x14a   : > { %787 = vrot.lane.b32.xlu1 %v3376_v43, %s2667_s0  ;;  %v679_v52 = vpop.trf.xlu0 }
 0x14b   : > { %781 = vrot.lane.b32.xlu0 %v3346_v38, %s2667_s0  ;;  %769 = vst [vmem:[%s3350_s9 + $0x3a0] sm:$0xff] %v679_v52 }
 0x14c   : > { %v3566_v29 = vpop.trf.xlu1 }
 0x14d   : > { %770 = vst [vmem:[%s3350_s9 + $0x3a8] sm:$0xff] %v3566_v29 }
 0x14e   : > { %789 = vrot.lane.b32.xlu1 %v3384_v51, %s2667_s0  ;;  %v680_v40 = vpop.trf.xlu0 }
 0x14f   : > { %791 = vrot.lane.b32.xlu0 %v3392_v53, %s2667_s0  ;;  %771 = vst [vmem:[%s3350_s9 + $0x3b0] sm:$0xff] %v680_v40 }
 0x150   : > { %v3575_v43 = vpop.trf.xlu1 }
 0x151   : > { %772 = vst [vmem:[%s3350_s9 + $0x3b8] sm:$0xff] %v3575_v43 }
 0x152   : > { %793 = vrot.lane.b32.xlu1 %v3400_v58, %s2667_s0  ;;  %v681_v38 = vpop.trf.xlu0 }
 0x153   : > { %795 = vrot.lane.b32.xlu0 %v3408_v61, %s2667_s0  ;;  %773 = vst [vmem:[%s3350_s9 + $0x3c0] sm:$0xff] %v681_v38 }
 0x154   : > { %v3584_v51 = vpop.trf.xlu1 }
 0x155   : > { %774 = vst [vmem:[%s3350_s9 + $0x3c8] sm:$0xff] %v3584_v51 }
 0x156   : > { %797 = vrot.lane.b32.xlu1 %v3416_v62, %s2667_s0  ;;  %v682_v53 = vpop.trf.xlu0 }
 0x157   : > { %799 = vrot.lane.b32.xlu0 %v3424_v11, %s2667_s0  ;;  %775 = vst [vmem:[%s3350_s9 + $0x3d0] sm:$0xff] %v682_v53 }
 0x158   : > { %v3593_v58 = vpop.trf.xlu1 }
 0x159   : > { %776 = vst [vmem:[%s3350_s9 + $0x3d8] sm:$0xff] %v3593_v58 }
 0x15a   : > { %801 = vrot.lane.b32.xlu1 %v3432_v15, %s2667_s0  ;;  %v683_v61 = vpop.trf.xlu0 }
 0x15b   : > { %803 = vrot.lane.b32.xlu0 %v3440_v21, %s2667_s0  ;;  %777 = vst [vmem:[%s3350_s9 + $0x3e0] sm:$0xff] %v683_v61 }
 0x15c   : > { %v3602_v37 = vpop.trf.xlu1 }
 0x15d   : > { %778 = vst [vmem:[%s3350_s9 + $0x3e8] sm:$0xff] %v3602_v37 }
 0x15e   : > { %805 = vrot.lane.b32.xlu1 %v3448_v16, %s2667_s0  ;;  %v684_v62 = vpop.trf.xlu0 }
 0x15f   : > { %807 = vrot.lane.b32.xlu0 %v3456_v23, %s2667_s0  ;;  %779 = vst [vmem:[%s3350_s9 + $0x3f0] sm:$0xff] %v684_v62 }
 0x160   : > { %v3611_v11 = vpop.trf.xlu1 }
 0x161   : > { %780 = vst [vmem:[%s3350_s9 + $0x3f8] sm:$0xff] %v3611_v11 }
 0x162   : > { %809 = vrot.lane.b32.xlu1 %v3464_v20, %s2667_s0  ;;  %v3617_v15 = vpop.trf.xlu0 }
 0x163   : > { %811 = vrot.lane.b32.xlu0 %v3472_v26, %s2667_s0 }
 0x164   : > { %v3621_v21 = vpop.trf.xlu1 }
 0x166   : > { %813 = vrot.lane.b32.xlu1 %v3480_v25, %s2667_s0  ;;  %v3625_v16 = vpop.trf.xlu0 }
 0x167   : > { %815 = vrot.lane.b32.xlu0 %v3488_v27, %s2667_s0 }
 0x168   : > { %v3629_v23 = vpop.trf.xlu1 }
 0x16a   : > { %817 = vrot.lane.b32.xlu1 %v3496_v31, %s2667_s0  ;;  %v3633_v20 = vpop.trf.xlu0 }
 0x16b   : > { %819 = vrot.lane.b32.xlu0 %v3504_v30, %s2667_s0 }
 0x16c   : > { %v3637_v26 = vpop.trf.xlu1 }
 0x16e   : > { %821 = vrot.lane.b32.xlu1 %v3512_v32, %s2667_s0  ;;  %v3643_v25 = vpop.trf.xlu0 }
 0x16f   : > { %823 = vrot.lane.b32.xlu0 %v3520_v35, %s2667_s0 }
 0x170   : > { %v3645_v27 = vpop.trf.xlu1 }
 0x172   : > { %825 = vrot.lane.b32.xlu1 %v3528_v36, %s2667_s0  ;;  %v3653_v30 = vpop.trf.xlu0 }
 0x173   : > { %827 = vrot.lane.b32.xlu0 %v3536_v7, %s2667_s0  ;;  %5485 = vst [vmem:[#allocation16_spill] sm:$0xff] %v3653_v30 }
 0x174   : > { %v3651_v31 = vpop.trf.xlu1 }
 0x176   : > { %829 = vrot.lane.b32.xlu1 %v3546_v12, %s2667_s0  ;;  %v3662_v35 = vpop.trf.xlu0 }
 0x177   : > { %831 = vrot.lane.b32.xlu0 %v678_v4, %s2667_s0 }
 0x178   : > { %v3658_v32 = vpop.trf.xlu1 }
 0x17a   : > { %833 = vrot.lane.b32.xlu1 %v679_v52, %s2667_s0  ;;  %v3670_v30 = vpop.trf.xlu0 }
 0x17b   : > { %835 = vrot.lane.b32.xlu0 %v680_v40, %s2667_s0 }
 0x17c   : > { %v3664_v36 = vpop.trf.xlu1 }
 0x17e   : > { %837 = vrot.lane.b32.xlu1 %v681_v38, %s2667_s0  ;;  %v3680_v52 = vpop.trf.xlu0 }
 0x17f   : > { %839 = vrot.lane.b32.xlu0 %v682_v53, %s2667_s0 }
 0x180   : > { %v3668_v7 = vpop.trf.xlu1 }
 0x182   : > { %841 = vrot.lane.b32.xlu1 %v683_v61, %s2667_s0  ;;  %v3688_v40 = vpop.trf.xlu0 }
 0x183   : > { %843 = vrot.lane.b32.xlu0 %v684_v62, %s2667_s0 }
 0x184   : > { %v3674_v4 = vpop.trf.xlu1 }
 0x186   : > { %845 = vrot.lane.b32.xlu1 %v3354_v46, %s2667_s0 }
 0x187   : > { %847 = vrot.lane.b32.xlu0 %v3364_v9, %s2667_s0  ;;  %v3700_v9 = vpop.trf.xlu0 }
 0x188   : > { %v3684_v12 = vpop.trf.xlu1 }
 0x18a   : > { %849 = vrot.lane.b32.xlu1 %v3372_v45, %s2667_s0 }
 0x18b   : > { %851 = vrot.lane.b32.xlu0 %v3380_v50, %s2667_s0  ;;  %v3708_v50 = vpop.trf.xlu0 }
 0x18c   : > { %v3694_v46 = vpop.trf.xlu1 }
 0x18e   : > { %853 = vrot.lane.b32.xlu1 %v3388_v55, %s2667_s0 }
 0x18f   : > { %855 = vrot.lane.b32.xlu0 %v3396_v60, %s2667_s0  ;;  %v3720_v60 = vpop.trf.xlu0 }
 0x190   : > { %v3704_v45 = vpop.trf.xlu1 }
 0x192   : > { %857 = vrot.lane.b32.xlu1 %v3404_v3, %s2667_s0 }
 0x193   : > { %859 = vrot.lane.b32.xlu0 %v3412_v13, %s2667_s0  ;;  %v3728_v13 = vpop.trf.xlu0 }
 0x194   : > { %v3714_v55 = vpop.trf.xlu1 }
 0x196   : > { %861 = vrot.lane.b32.xlu1 %v3420_v19, %s2667_s0 }
 0x197   : > { %863 = vrot.lane.b32.xlu0 %v3428_v28, %s2667_s0  ;;  %v3740_v28 = vpop.trf.xlu0 }
 0x198   : > { %v3724_v3 = vpop.trf.xlu1 }
 0x19a   : > { %865 = vrot.lane.b32.xlu1 %v3436_v34, %s2667_s0 }
 0x19b   : > { %867 = vrot.lane.b32.xlu0 %v3444_v42, %s2667_s0  ;;  %v3749_v42 = vpop.trf.xlu0 }
 0x19c   : > { %v3734_v19 = vpop.trf.xlu1 }
 0x19e   : > { %869 = vrot.lane.b32.xlu1 %v3452_v49, %s2667_s0 }
 0x19f   : > { %871 = vrot.lane.b32.xlu0 %v3460_v56, %s2667_s0  ;;  %v3762_v56 = vpop.trf.xlu0 }
 0x1a0   : > { %v3744_v34 = vpop.trf.xlu1 }
 0x1a2   : > { %873 = vrot.lane.b32.xlu1 %v3468_v63, %s2667_s0 }
 0x1a3   : > { %875 = vrot.lane.b32.xlu0 %v3476_v14, %s2667_s0  ;;  %v3766_v14 = vstv %s2247_s8 }
 0x1a4   : > { %v1051_v53 = vadd.s32 %v3766_v14, %v2966_v57 }
 0x1a6   : > { %877 = vrot.lane.b32.xlu1 %v3484_v24, %s2667_s0  ;;  %vm1067_vm2 = vcmp.lt.s32.totalorder %v1051_v53, 32768 }
 0x1a7   : > { %879 = vrot.lane.b32.xlu0 %v3492_v33, %s2667_s0  ;;  %v1077_v33 = vstv %s1076_s30 }
 0x1a8   : > { %vm3786_vm14 = vcmp.eq.s32.totalorder %v1077_v33, 1 }
 0x1aa   : > { %881 = vrot.lane.b32.xlu1 %v3500_v44, %s2667_s0 }
 0x1ab   : > { %883 = vrot.lane.b32.xlu0 %v3508_v54, %s2667_s0  ;;  %v1046_v54 = vadd.s32 %v3766_v14, %v2859_v8 }
 0x1ad   : > { %vm1062_vm5 = vcmp.lt.s32.totalorder %v1046_v54, 32768 }
 0x1ae   : > { %885 = vrot.lane.b32.xlu1 %v3516_v0, %s2667_s0  ;;  %vm3828_vm7 = vmand %vm3786_vm14, %vm1062_vm5 }
 0x1af   : > { %887 = vrot.lane.b32.xlu0 %v3524_v17, %s2667_s0  ;;  %v1129_v61 = vsel %vm3828_vm7, %v3637_v26, 0.0 }
 0x1b2   : > { %889 = vrot.lane.b32.xlu1 %v3532_v39, %s2667_s0  ;;  %v5526_v39 = vld [vmem:[#allocation16_spill] sm:$0xff] }
 0x1b3   : > { %891 = vrot.lane.b32.xlu0 %v3540_v2, %s2667_s0  ;;  %v1045_v2 = vadd.s32 %v3766_v14, %v2853_v5 }
 0x1b4   : > { %v3755_v49 = vpop.permute.xlu1 %783 }
 0x1b5   : > { %vm1061_vm12 = vcmp.lt.s32.totalorder %v1045_v2, 32768 }
 0x1b6   : > { %893 = vrot.lane.b32.xlu1 %v3550_v48, %s2667_s0  ;;  %v1044_v48 = vadd.s32 %v3766_v14, %v2846_v1  ;;  %v1047_v1 = vadd.s32 %v3766_v14, %v2863_v10  ;;  %vm3798_vm15 = vmand %vm3786_vm14, %vm1061_vm12  ;;  %v1048_v10 = vadd.s32 %v3766_v14, %v2873_v18 }
 0x1b7   : > { %895 = vrot.lane.b32.xlu0 %v3557_v59, %s2667_s0  ;;  %v1049_v59 = vadd.s32 %v3766_v14, %v2929_v41  ;;  %vm3886_vm12 = vmand %vm3786_vm14, %vm1067_vm2 }
 0x1b8   : > { %v3764_v63 = vpop.permute.xlu1 %785  ;;  %vm1060_vm13 = vcmp.lt.s32.totalorder %v1044_v48, 32768  ;;  %vm1063_vm6 = vcmp.lt.s32.totalorder %v1047_v1, 32768  ;;  %vm1064_vm9 = vcmp.lt.s32.totalorder %v1048_v10, 32768 }
 0x1b9   : > { %vm3806_vm4 = vmand %vm3786_vm14, %vm1060_vm13  ;;  %vm1065_vm10 = vcmp.lt.s32.totalorder %v1049_v59, 32768 }
 0x1ba   : > { %897 = vrot.lane.b32.xlu1 %v3566_v29, %s2667_s0  ;;  %v1127_v38 = vsel %vm3806_vm4, %v3621_v21, 0.0  ;;  %vm3834_vm8 = vmand %vm3786_vm14, %vm1063_vm6  ;;  %v1052_v21 = vadd.s32 %v3766_v14, %v2989_v6  ;;  %v5529_v6 = vld [vmem:[#allocation9_spill] sm:$0xff] }
 0x1bb   : > { %899 = vrot.lane.b32.xlu0 %v3575_v43, %s2667_s0  ;;  %vm3854_vm11 = vmand %vm3786_vm14, %vm1064_vm9 }
 0x1bc   : > { %v3776_v24 = vpop.permute.xlu1 %787  ;;  %vm3860_vm0 = vmand %vm3786_vm14, %vm1065_vm10  ;;  %vm1068_vm13 = vcmp.lt.s32.totalorder %v1052_v21, 32768 }
 0x1bd   : > { %v3778_v44 = vpop.permute.xlu0 %781  ;;  %v1132_v48 = vsel %vm3860_vm0, %v3658_v32, 0.0  ;;  %v5505_v32 = vld [vmem:[#allocation11_spill] sm:$0xff]  ;;  %vm3906_vm6 = vmand %vm3786_vm14, %vm1068_vm13 }
 0x1be   : > { %901 = vrot.lane.b32.xlu1 %v3584_v51, %s2667_s0  ;;  %v1050_v51 = vadd.s32 %v3766_v14, %v2943_v47  ;;  %v1055_v54 = vadd.s32 %v3766_v14, %v5505_v32  ;;  %v1135_v21 = vsel %vm3906_vm6, %v3674_v4, 0.0  ;;  %v5516_v4 = vld [vmem:[#allocation14_spill] sm:$0xff]  ;;  %v1150_v47 = vsel %vm3886_vm12, %v3680_v52, 0.0 }
 0x1bf   : > { %903 = vrot.lane.b32.xlu0 %v3593_v58, %s2667_s0 }
 0x1c0   : > { %v3792_v0 = vpop.permute.xlu1 %789  ;;  %vm1066_vm1 = vcmp.lt.s32.totalorder %v1050_v51, 32768  ;;  %v5508_v51 = vmov 0 }
 0x1c1   : > { %v3794_v17 = vpop.permute.xlu0 %791  ;;  %vm3880_vm3 = vmand %vm3786_vm14, %vm1066_vm1  ;;  %vm1071_vm1 = vcmp.lt.s32.totalorder %v1055_v54, 32768 }
 0x1c2   : > { %905 = vrot.lane.b32.xlu1 %v3602_v37, %s2667_s0  ;;  %v1128_v37 = vsel %vm3798_vm15, %v3629_v23, 0.0  ;;  %v1053_v23 = vadd.s32 %v3766_v14, %v3012_v22  ;;  %v1133_v10 = vsel %vm3880_vm3, %v3664_v36, 0.0  ;;  %v5510_v36 = vld [vmem:[#allocation12_spill] sm:$0xff]  ;;  %vm3938_vm13 = vmand %vm3786_vm14, %vm1071_vm1 }
 0x1c3   : > { %907 = vrot.lane.b32.xlu0 %v3611_v11, %s2667_s0  ;;  %v1130_v11 = vsel %vm3834_vm8, %v3645_v27, 0.0  ;;  %v1131_v27 = vsel %vm3854_vm11, %v3651_v31, 0.0  ;;  %v5504_v31 = vld [vmem:[#allocation10_spill] sm:$0xff]  ;;  %v1056_v53 = vadd.s32 %v3766_v14, %v5510_v36  ;;  %v1138_v36 = vsel %vm3938_vm13, %v3704_v45, 0.0 }
 0x1c4   : > { %v3816_v29 = vpop.permute.xlu1 %793  ;;  %v1054_v33 = vadd.s32 %v3766_v14, %v5504_v31  ;;  %vm1069_vm5 = vcmp.lt.s32.totalorder %v1053_v23, 32768 }
 0x1c5   : > { %v3821_v43 = vpop.permute.xlu0 %795  ;;  %vm3912_vm9 = vmand %vm3786_vm14, %vm1069_vm5  ;;  %vm1072_vm5 = vcmp.lt.s32.totalorder %v1056_v53, 32768 }
 0x1c6   : > { %1173 = vperm.xlu1 %2448, %v1128_v37   ;;  %v1134_v37 = vsel %vm3886_vm12, %v3668_v7, 0.0  ;;  %v5509_v51 = vsel %vm3912_vm9, 4294967295, %v5508_v51  ;;  %vm1070_vm10 = vcmp.lt.s32.totalorder %v1054_v33, 32768  ;;  %v5511_v7 = vld [vmem:[#allocation13_spill] sm:$0xff]  ;;  %v1058_v33 = vadd.s32 %v3766_v14, %v5516_v4 }
 0x1c7   : > { %1168 = vperm.xlu0 %2447, %v1127_v38   ;;  %v5506_v38 = vmov 0  ;;  %vm3932_vm2 = vmand %vm3786_vm14, %vm1070_vm10 }
 0x1c8   : > { %v3842_v58 = vpop.permute.xlu1 %797  ;;  %v5507_v38 = vsel %vm3906_vm6, 4294967295, %v5506_v38  ;;  %vm3958_vm10 = vmand %vm3786_vm14, %vm1072_vm5 }
 0x1c9   : > { %v3847_v62 = vpop.permute.xlu0 %799  ;;  %v1139_v45 = vsel %vm3958_vm10, %v3714_v55, 0.0  ;;  %v1155_v31 = vsel %vm3958_vm10, %v3728_v13, 0.0 }
 0x1ca   : > { %1178 = vperm.xlu1 %2448, %v1129_v61   ;;  %v1057_v61 = vadd.s32 %v3766_v14, %v5511_v7 }
 0x1cb   : > { %1183 = vperm.xlu0 %2447, %v1130_v11  }
 0x1cc   : > { %v3868_v26 = vpop.permute.xlu1 %801  ;;  %vm1073_vm6 = vcmp.lt.s32.totalorder %v1057_v61, 32768 }
 0x1cd   : > { %v3873_v2 = vpop.permute.xlu0 %803  ;;  %vm3964_vm1 = vmand %vm3786_vm14, %vm1073_vm6 }
 0x1ce   : > { %1188 = vperm.xlu1 %2448, %v1131_v27   ;;  %v1136_v27 = vsel %vm3912_vm9, %v3684_v12, 0.0  ;;  %v5517_v12 = vld [vmem:[#allocation15_spill] sm:$0xff]  ;;  %v1140_v61 = vsel %vm3964_vm1, %v3724_v3, 0.0 }
 0x1cf   : > { %1193 = vperm.xlu0 %2447, %v1132_v48   ;;  %v5512_v48 = vmov 0  ;;  %v1059_v32 = vadd.s32 %v3766_v14, %v5517_v12  ;;  %v1143_v12 = vsel %vm3806_vm4, %v3617_v15, 0.0  ;;  %v1146_v15 = vsel %vm3834_vm8, %v3643_v25, 0.0 }
 0x1d0   : > { %v3894_v1 = vpop.permute.xlu1 %805  ;;  %v5513_v48 = vsel %vm3932_vm2, 4294967295, %v5512_v48  ;;  %v1149_v25 = vsel %vm3880_vm3, %v3670_v30, 0.0  ;;  %vm909_vm4 = vcmp.lt.s32.totalorder %v5529_v6, 1  ;;  %vm1160_vm8 = vcmp.eq.s32.totalorder %v5529_v6, 0 }
 0x1d1   : > { %v3899_v59 = vpop.permute.xlu0 %807  ;;  %vm1075_vm9 = vcmp.lt.s32.totalorder %v1059_v32, 32768 }
 0x1d2   : > { %1198 = vperm.xlu1 %2448, %v1133_v10   ;;  %v1137_v10 = vsel %vm3932_vm2, %v3694_v46, 0.0  ;;  %vm1074_vm2 = vcmp.lt.s32.totalorder %v1058_v33, 32768  ;;  %vm3986_vm5 = vmand %vm3786_vm14, %vm1075_vm9 }
 0x1d3   : > { %1203 = vperm.xlu0 %2447, %v1134_v37   ;;  %vm3980_vm6 = vmand %vm3786_vm14, %vm1074_vm2  ;;  %v1142_v33 = vsel %vm3986_vm5, %v3744_v34, 0.0  ;;  %v1145_v34 = vsel %vm3828_vm7, %v3633_v20, 0.0  ;;  %v1148_v20 = vsel %vm3860_vm0, %v3662_v35, 0.0  ;;  %vm5527_vm14 = vnez %v5507_v38 }
 0x1d4   : > { %v3920_v11 = vpop.permute.xlu1 %809  ;;  %v1141_v3 = vsel %vm3980_vm6, %v3734_v19, 0.0  ;;  %v1144_v19 = vsel %vm3798_vm15, %v3625_v16, 0.0  ;;  %v1147_v16 = vsel %vm3854_vm11, %v5526_v39, 0.0  ;;  %v1151_v35 = vsel %vm5527_vm14, %v3688_v40, 0.0 }
 0x1d5   : > { %v3925_v23 = vpop.permute.xlu0 %811  ;;  %vm5528_vm15 = vnez %v5509_v51  ;;  %vm5530_vm7 = vnez %v5513_v48  ;;  %v1154_v51 = vsel %vm3938_vm13, %v3720_v60, 0.0 }
 0x1d6   : > { %1208 = vperm.xlu1 %2448, %v1135_v21   ;;  %v1152_v30 = vsel %vm5528_vm15, %v3700_v9, 0.0  ;;  %v1153_v22 = vsel %vm5530_vm7, %v3708_v50, 0.0 }
 0x1d7   : > { %1213 = vperm.xlu0 %2447, %v1136_v27  }
 0x1d8   : > { %v3946_v54 = vpop.permute.xlu1 %813 }
 0x1d9   : > { %v3951_v37 = vpop.permute.xlu0 %815 }
 0x1da   : > { %1218 = vperm.xlu1 %2448, %v1137_v10  }
 0x1db   : > { %1223 = vperm.xlu0 %2447, %v1138_v36  }
 0x1dc   : > { %v3968_v46 = vpop.permute.xlu1 %817 }
 0x1dd   : > { %v3973_v7 = vpop.permute.xlu0 %819 }
 0x1de   : > { %1228 = vperm.xlu1 %2448, %v1139_v45  }
 0x1df   : > { %1233 = vperm.xlu0 %2447, %v1140_v61  }
 0x1e0   : > { %v3990_v55 = vpop.permute.xlu1 %821 }
 0x1e1   : > { %v3995_v4 = vpop.permute.xlu0 %823 }
 0x1e2   : > { %1238 = vperm.xlu1 %2448, %v1141_v3  }
 0x1e3   : > { %1243 = vperm.xlu0 %2447, %v1142_v33   ;;  %v1156_v33 = vsel %vm3964_vm1, %v3740_v28, 0.0  ;;  %v1157_v28 = vsel %vm3980_vm6, %v3749_v42, 0.0 }
 0x1e4   : > { %v4000_v5 = vpop.permute.xlu1 %825 }
 0x1e5   : > { %v4005_v32 = vpop.permute.xlu0 %827 }
 0x1e6   : > { %1248 = vperm.xlu1 %2448, %v1143_v12  }
 0x1e7   : > { %1253 = vperm.xlu0 %2447, %v1144_v19   ;;  %v1158_v19 = vsel %vm3986_vm5, %v3762_v56, 0.0 }
 0x1e8   : > { %v4010_v10 = vpop.permute.xlu1 %829 }
 0x1e9   : > { %v4015_v36 = vpop.permute.xlu0 %831 }
 0x1ea   : > { %1258 = vperm.xlu1 %2448, %v1145_v34  }
 0x1eb   : > { %1263 = vperm.xlu0 %2447, %v1146_v15  }
 0x1ec   : > { %v4020_v8 = vpop.permute.xlu1 %833 }
 0x1ed   : > { %v4025_v45 = vpop.permute.xlu0 %835 }
 0x1ee   : > { %1268 = vperm.xlu1 %2448, %v1147_v16  }
 0x1ef   : > { %1273 = vperm.xlu0 %2447, %v1148_v20  }
 0x1f0   : > { %v4030_v18 = vpop.permute.xlu1 %837 }
 0x1f1   : > { %v4035_v41 = vpop.permute.xlu0 %839 }
 0x1f2   : > { %1278 = vperm.xlu1 %2448, %v1149_v25  }
 0x1f3   : > { %1283 = vperm.xlu0 %2447, %v1150_v47  }
 0x1f4   : > { %v4040_v61 = vpop.permute.xlu1 %841 }
 0x1f5   : > { %v4045_v57 = vpop.permute.xlu0 %843 }
 0x1f6   : > { %1288 = vperm.xlu1 %2448, %v1151_v35  }
 0x1f7   : > { %1293 = vperm.xlu0 %2447, %v1152_v30  }
 0x1f8   : > { %v846_v52 = vpop.permute.xlu1 %845 }
 0x1f9   : > { %v910_v40 = vsel %vm909_vm4, %v3778_v44, %v846_v52  ;;  %v4060_v38 = vsel %vm909_vm4, %v846_v52, %v3778_v44  ;;  %v848_v9 = vpop.permute.xlu0 %847 }
 0x1fa   : > { %1391 = vst [vmem:[%s3350_s9 + $0x8] sm:$0xff] %v910_v40  ;;  %v911_v50 = vsel %vm909_vm4, %v3755_v49, %v848_v9  ;;  %v4072_v48 = vsel %vm909_vm4, %v848_v9, %v3755_v49  ;;  %1298 = vperm.xlu1 %2448, %v1153_v22  }
 0x1fb   : > { %1393 = vst [vmem:[%s3350_s9 + $0x18] sm:$0xff] %v911_v50  ;;  %1303 = vperm.xlu0 %2447, %v1154_v51  }
 0x1fc   : > { %v850_v44 = vpop.permute.xlu1 %849 }
 0x1fd   : > { %v912_v60 = vsel %vm909_vm4, %v3764_v63, %v850_v44  ;;  %v4084_v3 = vsel %vm909_vm4, %v850_v44, %v3764_v63  ;;  %v852_v49 = vpop.permute.xlu0 %851 }
 0x1fe   : > { %1395 = vst [vmem:[%s3350_s9 + $0x28] sm:$0xff] %v912_v60  ;;  %v913_v13 = vsel %vm909_vm4, %v3776_v24, %v852_v49  ;;  %v4096_v53 = vsel %vm909_vm4, %v852_v49, %v3776_v24  ;;  %1308 = vperm.xlu1 %2448, %v1155_v31  }
 0x1ff   : > { %1397 = vst [vmem:[%s3350_s9 + $0x38] sm:$0xff] %v913_v13  ;;  %1313 = vperm.xlu0 %2447, %v1156_v33  }
 0x200   : > { %v854_v63 = vpop.permute.xlu1 %853 }
 0x201   : > { %v914_v14 = vsel %vm909_vm4, %v3792_v0, %v854_v63  ;;  %v4108_v12 = vsel %vm909_vm4, %v854_v63, %v3792_v0  ;;  %v856_v24 = vpop.permute.xlu0 %855 }
 0x202   : > { %1399 = vst [vmem:[%s3350_s9 + $0x48] sm:$0xff] %v914_v14  ;;  %v915_v42 = vsel %vm909_vm4, %v3794_v17, %v856_v24  ;;  %v4120_v21 = vsel %vm909_vm4, %v856_v24, %v3794_v17  ;;  %1318 = vperm.xlu1 %2448, %v1157_v28  }
 0x203   : > { %1401 = vst [vmem:[%s3350_s9 + $0x58] sm:$0xff] %v915_v42  ;;  %1323 = vperm.xlu0 %2447, %v1158_v19  }
 0x204   : > { %v858_v0 = vpop.permute.xlu1 %857 }
 0x205   : > { %v916_v56 = vsel %vm909_vm4, %v3816_v29, %v858_v0  ;;  %v4129_v27 = vsel %vm909_vm4, %v858_v0, %v3816_v29  ;;  %v860_v34 = vpop.permute.xlu0 %859 }
 0x206   : > { %1403 = vst [vmem:[%s3350_s9 + $0x68] sm:$0xff] %v916_v56  ;;  %v917_v17 = vsel %vm909_vm4, %v3821_v43, %v860_v34  ;;  %v4138_v15 = vsel %vm909_vm4, %v860_v34, %v3821_v43 }
 0x207   : > { %1405 = vst [vmem:[%s3350_s9 + $0x78] sm:$0xff] %v917_v17 }
 0x208   : > { %v862_v39 = vpop.permute.xlu1 %861 }
 0x209   : > { %v918_v29 = vsel %vm909_vm4, %v3842_v58, %v862_v39  ;;  %v4147_v16 = vsel %vm909_vm4, %v862_v39, %v3842_v58  ;;  %v864_v20 = vpop.permute.xlu0 %863 }
 0x20a   : > { %1407 = vst [vmem:[%s3350_s9 + $0x88] sm:$0xff] %v918_v29  ;;  %v919_v43 = vsel %vm909_vm4, %v3847_v62, %v864_v20  ;;  %v4156_v25 = vsel %vm909_vm4, %v864_v20, %v3847_v62 }
 0x20b   : > { %1409 = vst [vmem:[%s3350_s9 + $0x98] sm:$0xff] %v919_v43 }
 0x20c   : > { %v866_v47 = vpop.permute.xlu1 %865 }
 0x20d   : > { %v920_v58 = vsel %vm909_vm4, %v3868_v26, %v866_v47  ;;  %v4165_v35 = vsel %vm909_vm4, %v866_v47, %v3868_v26  ;;  %v868_v30 = vpop.permute.xlu0 %867 }
 0x20e   : > { %1411 = vst [vmem:[%s3350_s9 + $0xa8] sm:$0xff] %v920_v58  ;;  %v921_v62 = vsel %vm909_vm4, %v3873_v2, %v868_v30  ;;  %v4174_v52 = vsel %vm909_vm4, %v868_v30, %v3873_v2 }
 0x20f   : > { %1413 = vst [vmem:[%s3350_s9 + $0xb8] sm:$0xff] %v921_v62 }
 0x210   : > { %v870_v22 = vpop.permute.xlu1 %869 }
 0x211   : > { %v922_v26 = vsel %vm909_vm4, %v3894_v1, %v870_v22  ;;  %v4183_v40 = vsel %vm909_vm4, %v870_v22, %v3894_v1  ;;  %v872_v9 = vpop.permute.xlu0 %871 }
 0x212   : > { %1415 = vst [vmem:[%s3350_s9 + $0xc8] sm:$0xff] %v922_v26  ;;  %v923_v2 = vsel %vm909_vm4, %v3899_v59, %v872_v9  ;;  %v4192_v51 = vsel %vm909_vm4, %v872_v9, %v3899_v59 }
 0x213   : > { %1417 = vst [vmem:[%s3350_s9 + $0xd8] sm:$0xff] %v923_v2 }
 0x214   : > { %v874_v50 = vpop.permute.xlu1 %873 }
 0x215   : > { %v924_v1 = vsel %vm909_vm4, %v3920_v11, %v874_v50  ;;  %v4201_v44 = vsel %vm909_vm4, %v874_v50, %v3920_v11  ;;  %v876_v31 = vpop.permute.xlu0 %875 }
 0x216   : > { %1419 = vst [vmem:[%s3350_s9 + $0xe8] sm:$0xff] %v924_v1  ;;  %v925_v59 = vsel %vm909_vm4, %v3925_v23, %v876_v31  ;;  %v4210_v60 = vsel %vm909_vm4, %v876_v31, %v3925_v23 }
 0x217   : > { %1421 = vst [vmem:[%s3350_s9 + $0xf8] sm:$0xff] %v925_v59 }
 0x218   : > { %v878_v49 = vpop.permute.xlu1 %877 }
 0x219   : > { %v926_v11 = vsel %vm909_vm4, %v3946_v54, %v878_v49  ;;  %v4219_v33 = vsel %vm909_vm4, %v878_v49, %v3946_v54  ;;  %v880_v13 = vpop.permute.xlu0 %879 }
 0x21a   : > { %1423 = vst [vmem:[%s3350_s9 + $0x208] sm:$0xff] %v926_v11  ;;  %v927_v23 = vsel %vm909_vm4, %v3951_v37, %v880_v13  ;;  %v4228_v63 = vsel %vm909_vm4, %v880_v13, %v3951_v37 }
 0x21b   : > { %1425 = vst [vmem:[%s3350_s9 + $0x218] sm:$0xff] %v927_v23 }
 0x21c   : > { %v882_v28 = vpop.permute.xlu1 %881 }
 0x21d   : > { %v928_v54 = vsel %vm909_vm4, %v3968_v46, %v882_v28  ;;  %v4237_v14 = vsel %vm909_vm4, %v882_v28, %v3968_v46  ;;  %v884_v24 = vpop.permute.xlu0 %883 }
 0x21e   : > { %1427 = vst [vmem:[%s3350_s9 + $0x228] sm:$0xff] %v928_v54  ;;  %v929_v37 = vsel %vm909_vm4, %v3973_v7, %v884_v24  ;;  %v4246_v19 = vsel %vm909_vm4, %v884_v24, %v3973_v7 }
 0x21f   : > { %1429 = vst [vmem:[%s3350_s9 + $0x238] sm:$0xff] %v929_v37 }
 0x220   : > { %v886_v42 = vpop.permute.xlu1 %885 }
 0x221   : > { %v930_v46 = vsel %vm909_vm4, %v3990_v55, %v886_v42  ;;  %v4255_v0 = vsel %vm909_vm4, %v886_v42, %v3990_v55  ;;  %v888_v56 = vpop.permute.xlu0 %887 }
 0x222   : > { %1431 = vst [vmem:[%s3350_s9 + $0x248] sm:$0xff] %v930_v46  ;;  %v931_v7 = vsel %vm909_vm4, %v3995_v4, %v888_v56  ;;  %v4264_v34 = vsel %vm909_vm4, %v888_v56, %v3995_v4 }
 0x223   : > { %1433 = vst [vmem:[%s3350_s9 + $0x258] sm:$0xff] %v931_v7 }
 0x224   : > { %v890_v17 = vpop.permute.xlu1 %889 }
 0x225   : > { %v932_v55 = vsel %vm909_vm4, %v4000_v5, %v890_v17  ;;  %v4273_v39 = vsel %vm909_vm4, %v890_v17, %v4000_v5  ;;  %v892_v29 = vpop.permute.xlu0 %891 }
 0x226   : > { %1435 = vst [vmem:[%s3350_s9 + $0x268] sm:$0xff] %v932_v55  ;;  %v933_v4 = vsel %vm909_vm4, %v4005_v32, %v892_v29  ;;  %v4282_v20 = vsel %vm909_vm4, %v892_v29, %v4005_v32 }
 0x227   : > { %1437 = vst [vmem:[%s3350_s9 + $0x278] sm:$0xff] %v933_v4 }
 0x228   : > { %v894_v43 = vpop.permute.xlu1 %893 }
 0x229   : > { %v934_v5 = vsel %vm909_vm4, %v4010_v10, %v894_v43  ;;  %v4291_v47 = vsel %vm909_vm4, %v894_v43, %v4010_v10  ;;  %v896_v58 = vpop.permute.xlu0 %895 }
 0x22a   : > { %1439 = vst [vmem:[%s3350_s9 + $0x288] sm:$0xff] %v934_v5  ;;  %v935_v32 = vsel %vm909_vm4, %v4015_v36, %v896_v58  ;;  %v4300_v30 = vsel %vm909_vm4, %v896_v58, %v4015_v36 }
 0x22b   : > { %1441 = vst [vmem:[%s3350_s9 + $0x298] sm:$0xff] %v935_v32 }
 0x22c   : > { %v898_v62 = vpop.permute.xlu1 %897 }
 0x22d   : > { %v936_v10 = vsel %vm909_vm4, %v4020_v8, %v898_v62  ;;  %v4309_v22 = vsel %vm909_vm4, %v898_v62, %v4020_v8  ;;  %v900_v26 = vpop.permute.xlu0 %899 }
 0x22e   : > { %1443 = vst [vmem:[%s3350_s9 + $0x2a8] sm:$0xff] %v936_v10  ;;  %v937_v36 = vsel %vm909_vm4, %v4025_v45, %v900_v26  ;;  %v4318_v9 = vsel %vm909_vm4, %v900_v26, %v4025_v45 }
 0x22f   : > { %1445 = vst [vmem:[%s3350_s9 + $0x2b8] sm:$0xff] %v937_v36 }
 0x230   : > { %v902_v2 = vpop.permute.xlu1 %901 }
 0x231   : > { %v938_v8 = vsel %vm909_vm4, %v4030_v18, %v902_v2  ;;  %v4327_v50 = vsel %vm909_vm4, %v902_v2, %v4030_v18  ;;  %v904_v1 = vpop.permute.xlu0 %903 }
 0x232   : > { %1447 = vst [vmem:[%s3350_s9 + $0x2c8] sm:$0xff] %v938_v8  ;;  %v939_v45 = vsel %vm909_vm4, %v4035_v41, %v904_v1  ;;  %v4336_v31 = vsel %vm909_vm4, %v904_v1, %v4035_v41 }
 0x233   : > { %1449 = vst [vmem:[%s3350_s9 + $0x2d8] sm:$0xff] %v939_v45 }
 0x234   : > { %v906_v59 = vpop.permute.xlu1 %905 }
 0x235   : > { %v940_v18 = vsel %vm909_vm4, %v4040_v61, %v906_v59  ;;  %v4345_v49 = vsel %vm909_vm4, %v906_v59, %v4040_v61  ;;  %v908_v11 = vpop.permute.xlu0 %907 }
 0x236   : > { %1451 = vst [vmem:[%s3350_s9 + $0x2e8] sm:$0xff] %v940_v18  ;;  %v941_v41 = vsel %vm909_vm4, %v4045_v57, %v908_v11  ;;  %v4354_v13 = vsel %vm909_vm4, %v908_v11, %v4045_v57 }
 0x237   : > { %1453 = vst [vmem:[%s3350_s9 + $0x2f8] sm:$0xff] %v941_v41 }
 0x241   : > { %v1174_v23 = vpop.permute.xlu1 %1173 }
 0x242   : > { %v1328_v61 = vsel %vm1160_vm8, %v1174_v23, %v4072_v48  ;;  %v1169_v28 = vpop.permute.xlu0 %1168 }
 0x243   : > { %1392 = vst [vmem:[%s3350_s9 + $0x10] sm:$0xff] %v1328_v61  ;;  %v1326_v54 = vsel %vm1160_vm8, %v1169_v28, %v4060_v38 }
 0x244   : > { %1390 = vst [vmem:[%s3350_s9] sm:$0xff] %v1326_v54 }
 0x245   : > { %v1179_v57 = vpop.permute.xlu1 %1178 }
 0x246   : > { %v1330_v24 = vsel %vm1160_vm8, %v1179_v57, %v4084_v3  ;;  %v1184_v37 = vpop.permute.xlu0 %1183 }
 0x247   : > { %1394 = vst [vmem:[%s3350_s9 + $0x20] sm:$0xff] %v1330_v24  ;;  %v1332_v48 = vsel %vm1160_vm8, %v1184_v37, %v4096_v53 }
 0x248   : > { %1396 = vst [vmem:[%s3350_s9 + $0x30] sm:$0xff] %v1332_v48 }
 0x249   : > { %v1189_v42 = vpop.permute.xlu1 %1188 }
 0x24a   : > { %v1334_v38 = vsel %vm1160_vm8, %v1189_v42, %v4108_v12  ;;  %v1194_v46 = vpop.permute.xlu0 %1193 }
 0x24b   : > { %1398 = vst [vmem:[%s3350_s9 + $0x40] sm:$0xff] %v1334_v38  ;;  %v1336_v3 = vsel %vm1160_vm8, %v1194_v46, %v4120_v21 }
 0x24c   : > { %1400 = vst [vmem:[%s3350_s9 + $0x50] sm:$0xff] %v1336_v3 }
 0x24d   : > { %v1199_v56 = vpop.permute.xlu1 %1198 }
 0x24e   : > { %v1338_v53 = vsel %vm1160_vm8, %v1199_v56, %v4129_v27  ;;  %v1204_v7 = vpop.permute.xlu0 %1203 }
 0x24f   : > { %1402 = vst [vmem:[%s3350_s9 + $0x60] sm:$0xff] %v1338_v53  ;;  %v1340_v12 = vsel %vm1160_vm8, %v1204_v7, %v4138_v15 }
 0x250   : > { %1404 = vst [vmem:[%s3350_s9 + $0x70] sm:$0xff] %v1340_v12 }
 0x251   : > { %v1209_v17 = vpop.permute.xlu1 %1208 }
 0x252   : > { %v1342_v21 = vsel %vm1160_vm8, %v1209_v17, %v4147_v16  ;;  %v1214_v55 = vpop.permute.xlu0 %1213 }
 0x253   : > { %1406 = vst [vmem:[%s3350_s9 + $0x80] sm:$0xff] %v1342_v21  ;;  %v1344_v27 = vsel %vm1160_vm8, %v1214_v55, %v4156_v25 }
 0x254   : > { %1408 = vst [vmem:[%s3350_s9 + $0x90] sm:$0xff] %v1344_v27 }
 0x255   : > { %v1219_v29 = vpop.permute.xlu1 %1218 }
 0x256   : > { %v1346_v15 = vsel %vm1160_vm8, %v1219_v29, %v4165_v35  ;;  %v1224_v4 = vpop.permute.xlu0 %1223 }
 0x257   : > { %1410 = vst [vmem:[%s3350_s9 + $0xa0] sm:$0xff] %v1346_v15  ;;  %v1348_v16 = vsel %vm1160_vm8, %v1224_v4, %v4174_v52 }
 0x258   : > { %1412 = vst [vmem:[%s3350_s9 + $0xb0] sm:$0xff] %v1348_v16 }
 0x259   : > { %v1229_v43 = vpop.permute.xlu1 %1228 }
 0x25a   : > { %v1350_v25 = vsel %vm1160_vm8, %v1229_v43, %v4183_v40  ;;  %v1234_v5 = vpop.permute.xlu0 %1233 }
 0x25b   : > { %1414 = vst [vmem:[%s3350_s9 + $0xc0] sm:$0xff] %v1350_v25  ;;  %v1352_v35 = vsel %vm1160_vm8, %v1234_v5, %v4192_v51 }
 0x25c   : > { %1416 = vst [vmem:[%s3350_s9 + $0xd0] sm:$0xff] %v1352_v35 }
 0x25d   : > { %v1239_v58 = vpop.permute.xlu1 %1238 }
 0x25e   : > { %v1354_v52 = vsel %vm1160_vm8, %v1239_v58, %v4201_v44  ;;  %v1244_v32 = vpop.permute.xlu0 %1243 }
 0x25f   : > { %1418 = vst [vmem:[%s3350_s9 + $0xe0] sm:$0xff] %v1354_v52  ;;  %v1356_v40 = vsel %vm1160_vm8, %v1244_v32, %v4210_v60 }
 0x260   : > { %1420 = vst [vmem:[%s3350_s9 + $0xf0] sm:$0xff] %v1356_v40 }
 0x261   : > { %v1249_v62 = vpop.permute.xlu1 %1248 }
 0x262   : > { %v1358_v51 = vsel %vm1160_vm8, %v1249_v62, %v4219_v33  ;;  %v1254_v10 = vpop.permute.xlu0 %1253 }
 0x263   : > { %1422 = vst [vmem:[%s3350_s9 + $0x200] sm:$0xff] %v1358_v51  ;;  %v1360_v44 = vsel %vm1160_vm8, %v1254_v10, %v4228_v63 }
 0x264   : > { %1424 = vst [vmem:[%s3350_s9 + $0x210] sm:$0xff] %v1360_v44 }
 0x265   : > { %v1259_v26 = vpop.permute.xlu1 %1258 }
 0x266   : > { %v1362_v60 = vsel %vm1160_vm8, %v1259_v26, %v4237_v14  ;;  %v1264_v36 = vpop.permute.xlu0 %1263 }
 0x267   : > { %1426 = vst [vmem:[%s3350_s9 + $0x220] sm:$0xff] %v1362_v60  ;;  %v1364_v33 = vsel %vm1160_vm8, %v1264_v36, %v4246_v19 }
 0x268   : > { %1428 = vst [vmem:[%s3350_s9 + $0x230] sm:$0xff] %v1364_v33 }
 0x269   : > { %v1269_v2 = vpop.permute.xlu1 %1268 }
 0x26a   : > { %v1366_v63 = vsel %vm1160_vm8, %v1269_v2, %v4255_v0  ;;  %v1274_v8 = vpop.permute.xlu0 %1273 }
 0x26b   : > { %1430 = vst [vmem:[%s3350_s9 + $0x240] sm:$0xff] %v1366_v63  ;;  %v1368_v14 = vsel %vm1160_vm8, %v1274_v8, %v4264_v34 }
 0x26c   : > { %1432 = vst [vmem:[%s3350_s9 + $0x250] sm:$0xff] %v1368_v14 }
 0x26d   : > { %v1279_v1 = vpop.permute.xlu1 %1278 }
 0x26e   : > { %v1370_v19 = vsel %vm1160_vm8, %v1279_v1, %v4273_v39  ;;  %v1284_v45 = vpop.permute.xlu0 %1283 }
 0x26f   : > { %1434 = vst [vmem:[%s3350_s9 + $0x260] sm:$0xff] %v1370_v19  ;;  %v1372_v0 = vsel %vm1160_vm8, %v1284_v45, %v4282_v20 }
 0x270   : > { %1436 = vst [vmem:[%s3350_s9 + $0x270] sm:$0xff] %v1372_v0 }
 0x271   : > { %v1289_v59 = vpop.permute.xlu1 %1288 }
 0x272   : > { %v1374_v34 = vsel %vm1160_vm8, %v1289_v59, %v4291_v47  ;;  %v1294_v18 = vpop.permute.xlu0 %1293 }
 0x273   : > { %1438 = vst [vmem:[%s3350_s9 + $0x280] sm:$0xff] %v1374_v34  ;;  %v1376_v39 = vsel %vm1160_vm8, %v1294_v18, %v4300_v30 }
 0x274   : > { %1440 = vst [vmem:[%s3350_s9 + $0x290] sm:$0xff] %v1376_v39 }
 0x275   : > { %v1299_v11 = vpop.permute.xlu1 %1298 }
 0x276   : > { %v1378_v20 = vsel %vm1160_vm8, %v1299_v11, %v4309_v22  ;;  %v1304_v41 = vpop.permute.xlu0 %1303 }
 0x277   : > { %1442 = vst [vmem:[%s3350_s9 + $0x2a0] sm:$0xff] %v1378_v20  ;;  %v1380_v47 = vsel %vm1160_vm8, %v1304_v41, %v4318_v9 }
 0x278   : > { %1444 = vst [vmem:[%s3350_s9 + $0x2b0] sm:$0xff] %v1380_v47 }
 0x279   : > { %v1309_v23 = vpop.permute.xlu1 %1308 }
 0x27a   : > { %v1382_v30 = vsel %vm1160_vm8, %v1309_v23, %v4327_v50  ;;  %v1314_v61 = vpop.permute.xlu0 %1313 }
 0x27b   : > { %1446 = vst [vmem:[%s3350_s9 + $0x2c0] sm:$0xff] %v1382_v30  ;;  %v1384_v28 = vsel %vm1160_vm8, %v1314_v61, %v4336_v31 }
 0x27c   : > { %1448 = vst [vmem:[%s3350_s9 + $0x2d0] sm:$0xff] %v1384_v28  ;;  %1460 = sbr.rel (!%p5531_p5) target bundleno = 879 (0x36f), region = 40 }
 0x27d   : > { %v1319_v22 = vpop.permute.xlu1 %1318 }
 0x27e   : > { %v1386_v54 = vsel %vm1160_vm8, %v1319_v22, %v4345_v49  ;;  %v1324_v57 = vpop.permute.xlu0 %1323 }
 0x27f   : > { %1450 = vst [vmem:[%s3350_s9 + $0x2e0] sm:$0xff] %v1386_v54  ;;  %v1388_v9 = vsel %vm1160_vm8, %v1324_v57, %v4354_v13 }
 0x280   : > { %1452 = vst [vmem:[%s3350_s9 + $0x2f0] sm:$0xff] %v1388_v9 }
 0x281   : > { %s5561_s11 = smov (!%p1464_p9, %s1463_s11), 2 }
 0x282   : > { %s2250_s14 = sshll.u32 %s5561_s11, 13  ;;  %s4495_s19 = sshll.u32 %s5561_s11, 3 }
 0x283   : > { %p2254_p2 = scmp.eq.s32.totalorder %s2250_s14, 0 }
 0x284   : > { %p1476_p4 = scmp.lt.u32.totalorder (!%p2254_p2), %s4495_s19, 8 }
 0x285   : > { %1475 = sbr.rel (%p2254_p2) target bundleno = 879 (0x36f), region = 44 }
 0x28a   : > { %1479 = sbr.rel (%p1476_p4) target bundleno = 808 (0x328), region = 48  ;;  %s4499_s26 = sand.u32 (!%p1476_p4), 7, %s4495_s19  }
 0x28b   : > { %p1622_p10 = scmp.eq.s32.totalorder (!%p1476_p4), %s4499_s26, 0  ;;  %p2255_p11 = scmp.ne.s32.totalorder (!%p1476_p4), %s4499_s26, 0 }
 0x28f   : > { %1625 = sbr.rel (%p2255_p11) target bundleno = 698 (0x2ba), region = 63  ;;  %s4504_s16 = sshrl.u32 (!%p2255_p11), %s4495_s19, 3 }
 0x290   : > { %p2256_p12 = scmp.le.s32.totalorder (!%p2255_p11), %s4504_s16, 0 }
 0x294   : > { %2146 = sbr.rel (%p2256_p12) target bundleno = 698 (0x2ba), region = 137  ;;  %s5532_s27 = smov (!%p2256_p12), %s4493_s6 }
 0x295   : > { %s5533_s22 = smov (!%p2256_p12), %s3350_s9  ;;  %s4513_s5 = smov (!%p2256_p12), 0  }
 0x296   : > { %s4515_s4 = smov (!%p2256_p12), 0  }
 0x299 LB: >> { %v1638_v6 = vld [vmem:[%s2636_s22] sm:$0xff]  ;;  %v1640_v50 = vld [vmem:[%s2636_s22 + $0x10] sm:$0xff]  ;;  %s1766_s0 = sadd.s32 1, %s2640_s5  ;;  %s1632_s4 = sadd.s32 1, %s2644_s4   ;;  %s2644_s4 = sphi %s4515_s4, %s1632_s4   ;;  %s2640_s5 = sphi %s4513_s5, %s5536_s5   ;;  %s2636_s22 = sphi %s5533_s22, %s5535_s22   ;;  %s2632_s27 = sphi %s5532_s27, %s5534_s27  }
 0x29a   : >> { %v1642_v31 = vld [vmem:[%s2636_s22 + $0x20] sm:$0xff]  ;;  %1639 = vst [vmem:[%s2632_s27] sm:$0xff] %v1638_v6  ;;  %1641 = vst [vmem:[%s2632_s27 + $0x18] sm:$0xff] %v1640_v50  ;;  %v1644_v49 = vld [vmem:[%s2636_s22 + $0x30] sm:$0xff]  ;;  %p1767_p13 = scmp.ge.s32.totalorder %s1766_s0, %s4504_s16  ;;  %p1631_p0 = scmp.ge.s32.totalorder %s1632_s4, %s4504_s16 }
 0x29b   : >> { %1643 = vst [vmem:[%s2632_s27 + $0x30] sm:$0xff] %v1642_v31  ;;  %v1646_v13 = vld [vmem:[%s2636_s22 + $0x40] sm:$0xff]  ;;  %v1648_v24 = vld [vmem:[%s2636_s22 + $0x50] sm:$0xff]  ;;  %1645 = vst [vmem:[%s2632_s27 + $0x48] sm:$0xff] %v1644_v49 }
 0x29c   : >> { %1647 = vst [vmem:[%s2632_s27 + $0x60] sm:$0xff] %v1646_v13  ;;  %1649 = vst [vmem:[%s2632_s27 + $0x78] sm:$0xff] %v1648_v24  ;;  %v1650_v37 = vld [vmem:[%s2636_s22 + $0x60] sm:$0xff]  ;;  %v1652_v48 = vld [vmem:[%s2636_s22 + $0x70] sm:$0xff]  ;;  %s5563_s0 = smov (%p1767_p13, %s1766_s0), 0 }
 0x29d   : >> { %v1654_v42 = vld [vmem:[%s2636_s22 + $0x80] sm:$0xff]  ;;  %1651 = vst [vmem:[%s2632_s27 + $0x90] sm:$0xff] %v1650_v37  ;;  %1653 = vst [vmem:[%s2632_s27 + $0xa8] sm:$0xff] %v1652_v48  ;;  %v1656_v38 = vld [vmem:[%s2636_s22 + $0x90] sm:$0xff]  ;;  %s2257_s28 = sshll.u32 %s5563_s0, 3  ;;  %s5536_s5 = smov %s5563_s0 }
 0x29e   : >> { %1655 = vst [vmem:[%s2632_s27 + $0xc0] sm:$0xff] %v1654_v42  ;;  %v1658_v46 = vld [vmem:[%s2636_s22 + $0xa0] sm:$0xff]  ;;  %v1660_v3 = vld [vmem:[%s2636_s22 + $0xb0] sm:$0xff]  ;;  %1657 = vst [vmem:[%s2632_s27 + $0xd8] sm:$0xff] %v1656_v38  ;;  %s4571_s23 = scalar_lea.vmem %s3350_s9, %s2257_s28 [#allocation6]   ;;  %s4574_s8 = scalar_lea.vmem %s4493_s6, %s2257_s28  }
 0x29f   : >> { %1659 = vst [vmem:[%s2632_s27 + $0xf0] sm:$0xff] %v1658_v46  ;;  %1661 = vst [vmem:[%s2632_s27 + $0x108] sm:$0xff] %v1660_v3  ;;  %v1662_v56 = vld [vmem:[%s2636_s22 + $0xc0] sm:$0xff]  ;;  %v1664_v53 = vld [vmem:[%s2636_s22 + $0xd0] sm:$0xff] }
 0x2a0   : >> { %v1666_v7 = vld [vmem:[%s2636_s22 + $0xe0] sm:$0xff]  ;;  %1663 = vst [vmem:[%s2632_s27 + $0x120] sm:$0xff] %v1662_v56  ;;  %1665 = vst [vmem:[%s2632_s27 + $0x138] sm:$0xff] %v1664_v53  ;;  %v1668_v12 = vld [vmem:[%s2636_s22 + $0xf0] sm:$0xff] }
 0x2a1   : >> { %1667 = vst [vmem:[%s2632_s27 + $0x150] sm:$0xff] %v1666_v7  ;;  %v1670_v17 = vld [vmem:[%s2636_s22 + $0x100] sm:$0xff]  ;;  %v1672_v21 = vld [vmem:[%s2636_s22 + $0x110] sm:$0xff]  ;;  %1669 = vst [vmem:[%s2632_s27 + $0x168] sm:$0xff] %v1668_v12 }
 0x2a2   : >> { %1671 = vst [vmem:[%s2632_s27 + $0x180] sm:$0xff] %v1670_v17  ;;  %1673 = vst [vmem:[%s2632_s27 + $0x198] sm:$0xff] %v1672_v21  ;;  %v1674_v55 = vld [vmem:[%s2636_s22 + $0x120] sm:$0xff]  ;;  %v1676_v27 = vld [vmem:[%s2636_s22 + $0x130] sm:$0xff] }
 0x2a3   : >> { %v1678_v29 = vld [vmem:[%s2636_s22 + $0x140] sm:$0xff]  ;;  %1675 = vst [vmem:[%s2632_s27 + $0x1b0] sm:$0xff] %v1674_v55  ;;  %1677 = vst [vmem:[%s2632_s27 + $0x1c8] sm:$0xff] %v1676_v27  ;;  %v1680_v15 = vld [vmem:[%s2636_s22 + $0x150] sm:$0xff] }
 0x2a4   : >> { %1679 = vst [vmem:[%s2632_s27 + $0x1e0] sm:$0xff] %v1678_v29  ;;  %v1682_v4 = vld [vmem:[%s2636_s22 + $0x160] sm:$0xff]  ;;  %v1684_v16 = vld [vmem:[%s2636_s22 + $0x170] sm:$0xff]  ;;  %1681 = vst [vmem:[%s2632_s27 + $0x1f8] sm:$0xff] %v1680_v15 }
 0x2a5   : >> { %1683 = vst [vmem:[%s2632_s27 + $0x210] sm:$0xff] %v1682_v4  ;;  %1685 = vst [vmem:[%s2632_s27 + $0x228] sm:$0xff] %v1684_v16  ;;  %v1686_v43 = vld [vmem:[%s2636_s22 + $0x180] sm:$0xff]  ;;  %v1688_v25 = vld [vmem:[%s2636_s22 + $0x190] sm:$0xff] }
 0x2a6   : >> { %v1690_v5 = vld [vmem:[%s2636_s22 + $0x1a0] sm:$0xff]  ;;  %1687 = vst [vmem:[%s2632_s27 + $0x240] sm:$0xff] %v1686_v43  ;;  %1689 = vst [vmem:[%s2632_s27 + $0x258] sm:$0xff] %v1688_v25  ;;  %v1692_v35 = vld [vmem:[%s2636_s22 + $0x1b0] sm:$0xff] }
 0x2a7   : >> { %1691 = vst [vmem:[%s2632_s27 + $0x270] sm:$0xff] %v1690_v5  ;;  %v1694_v58 = vld [vmem:[%s2636_s22 + $0x1c0] sm:$0xff]  ;;  %v1696_v52 = vld [vmem:[%s2636_s22 + $0x1d0] sm:$0xff]  ;;  %1693 = vst [vmem:[%s2632_s27 + $0x288] sm:$0xff] %v1692_v35 }
 0x2a8   : >> { %1695 = vst [vmem:[%s2632_s27 + $0x2a0] sm:$0xff] %v1694_v58  ;;  %1697 = vst [vmem:[%s2632_s27 + $0x2b8] sm:$0xff] %v1696_v52  ;;  %v1698_v32 = vld [vmem:[%s2636_s22 + $0x1e0] sm:$0xff]  ;;  %v1700_v40 = vld [vmem:[%s2636_s22 + $0x1f0] sm:$0xff] }
 0x2a9   : >> { %v1702_v62 = vld [vmem:[%s2636_s22 + $0x200] sm:$0xff]  ;;  %1699 = vst [vmem:[%s2632_s27 + $0x2d0] sm:$0xff] %v1698_v32  ;;  %1701 = vst [vmem:[%s2632_s27 + $0x2e8] sm:$0xff] %v1700_v40  ;;  %v1704_v51 = vld [vmem:[%s2636_s22 + $0x210] sm:$0xff] }
 0x2aa   : >> { %1703 = vst [vmem:[%s2632_s27 + $0x300] sm:$0xff] %v1702_v62  ;;  %v1706_v10 = vld [vmem:[%s2636_s22 + $0x220] sm:$0xff]  ;;  %v1708_v44 = vld [vmem:[%s2636_s22 + $0x230] sm:$0xff]  ;;  %1705 = vst [vmem:[%s2632_s27 + $0x318] sm:$0xff] %v1704_v51 }
 0x2ab   : >> { %1707 = vst [vmem:[%s2632_s27 + $0x330] sm:$0xff] %v1706_v10  ;;  %1709 = vst [vmem:[%s2632_s27 + $0x348] sm:$0xff] %v1708_v44  ;;  %v1710_v26 = vld [vmem:[%s2636_s22 + $0x240] sm:$0xff]  ;;  %v1712_v60 = vld [vmem:[%s2636_s22 + $0x250] sm:$0xff] }
 0x2ac   : >> { %v1714_v36 = vld [vmem:[%s2636_s22 + $0x260] sm:$0xff]  ;;  %1711 = vst [vmem:[%s2632_s27 + $0x360] sm:$0xff] %v1710_v26  ;;  %1713 = vst [vmem:[%s2632_s27 + $0x378] sm:$0xff] %v1712_v60  ;;  %v1716_v33 = vld [vmem:[%s2636_s22 + $0x270] sm:$0xff] }
 0x2ad   : >> { %1715 = vst [vmem:[%s2632_s27 + $0x390] sm:$0xff] %v1714_v36  ;;  %v1718_v2 = vld [vmem:[%s2636_s22 + $0x280] sm:$0xff]  ;;  %v1720_v63 = vld [vmem:[%s2636_s22 + $0x290] sm:$0xff]  ;;  %1717 = vst [vmem:[%s2632_s27 + $0x3a8] sm:$0xff] %v1716_v33 }
 0x2ae   : >> { %1719 = vst [vmem:[%s2632_s27 + $0x3c0] sm:$0xff] %v1718_v2  ;;  %1721 = vst [vmem:[%s2632_s27 + $0x3d8] sm:$0xff] %v1720_v63  ;;  %v1722_v8 = vld [vmem:[%s2636_s22 + $0x2a0] sm:$0xff]  ;;  %v1724_v14 = vld [vmem:[%s2636_s22 + $0x2b0] sm:$0xff] }
 0x2af   : >> { %v1726_v1 = vld [vmem:[%s2636_s22 + $0x2c0] sm:$0xff]  ;;  %1723 = vst [vmem:[%s2632_s27 + $0x3f0] sm:$0xff] %v1722_v8  ;;  %1725 = vst [vmem:[%s2632_s27 + $0x408] sm:$0xff] %v1724_v14  ;;  %v1728_v19 = vld [vmem:[%s2636_s22 + $0x2d0] sm:$0xff] }
 0x2b0   : >> { %1727 = vst [vmem:[%s2632_s27 + $0x420] sm:$0xff] %v1726_v1  ;;  %v1730_v45 = vld [vmem:[%s2636_s22 + $0x2e0] sm:$0xff]  ;;  %v1732_v0 = vld [vmem:[%s2636_s22 + $0x2f0] sm:$0xff]  ;;  %1729 = vst [vmem:[%s2632_s27 + $0x438] sm:$0xff] %v1728_v19 }
 0x2b1   : >> { %1731 = vst [vmem:[%s2632_s27 + $0x450] sm:$0xff] %v1730_v45  ;;  %1733 = vst [vmem:[%s2632_s27 + $0x468] sm:$0xff] %v1732_v0  ;;  %v1734_v59 = vld [vmem:[%s2636_s22 + $0x300] sm:$0xff]  ;;  %v1736_v34 = vld [vmem:[%s2636_s22 + $0x310] sm:$0xff] }
 0x2b2   : >> { %v1738_v18 = vld [vmem:[%s2636_s22 + $0x320] sm:$0xff]  ;;  %1735 = vst [vmem:[%s2632_s27 + $0x480] sm:$0xff] %v1734_v59  ;;  %1737 = vst [vmem:[%s2632_s27 + $0x498] sm:$0xff] %v1736_v34  ;;  %v1740_v39 = vld [vmem:[%s2636_s22 + $0x330] sm:$0xff] }
 0x2b3   : >> { %1739 = vst [vmem:[%s2632_s27 + $0x4b0] sm:$0xff] %v1738_v18  ;;  %v1742_v11 = vld [vmem:[%s2636_s22 + $0x340] sm:$0xff]  ;;  %v1744_v20 = vld [vmem:[%s2636_s22 + $0x350] sm:$0xff]  ;;  %1741 = vst [vmem:[%s2632_s27 + $0x4c8] sm:$0xff] %v1740_v39 }
 0x2b4   : >> { %1743 = vst [vmem:[%s2632_s27 + $0x4e0] sm:$0xff] %v1742_v11  ;;  %1745 = vst [vmem:[%s2632_s27 + $0x4f8] sm:$0xff] %v1744_v20  ;;  %v1746_v41 = vld [vmem:[%s2636_s22 + $0x360] sm:$0xff]  ;;  %v1748_v47 = vld [vmem:[%s2636_s22 + $0x370] sm:$0xff] }
 0x2b5   : >> { %v1750_v23 = vld [vmem:[%s2636_s22 + $0x380] sm:$0xff]  ;;  %1747 = vst [vmem:[%s2632_s27 + $0x510] sm:$0xff] %v1746_v41  ;;  %1749 = vst [vmem:[%s2632_s27 + $0x528] sm:$0xff] %v1748_v47  ;;  %v1752_v30 = vld [vmem:[%s2636_s22 + $0x390] sm:$0xff]  ;;  %1634 = sbr.rel (!%p1631_p0) target bundleno = 665 (0x299), region = 143 }
 0x2b6   : >> { %1751 = vst [vmem:[%s2632_s27 + $0x540] sm:$0xff] %v1750_v23  ;;  %v1754_v61 = vld [vmem:[%s2636_s22 + $0x3a0] sm:$0xff]  ;;  %v1756_v28 = vld [vmem:[%s2636_s22 + $0x3b0] sm:$0xff]  ;;  %1753 = vst [vmem:[%s2632_s27 + $0x558] sm:$0xff] %v1752_v30 }
 0x2b7   : >> { %1755 = vst [vmem:[%s2632_s27 + $0x570] sm:$0xff] %v1754_v61  ;;  %1757 = vst [vmem:[%s2632_s27 + $0x588] sm:$0xff] %v1756_v28  ;;  %v1758_v22 = vld [vmem:[%s2636_s22 + $0x3c0] sm:$0xff]  ;;  %v1760_v54 = vld [vmem:[%s2636_s22 + $0x3d0] sm:$0xff] }
 0x2b8   : >> { %v1762_v57 = vld [vmem:[%s2636_s22 + $0x3e0] sm:$0xff]  ;;  %1759 = vst [vmem:[%s2632_s27 + $0x5a0] sm:$0xff] %v1758_v22  ;;  %1761 = vst [vmem:[%s2632_s27 + $0x5b8] sm:$0xff] %v1760_v54  ;;  %v1764_v9 = vld [vmem:[%s2636_s22 + $0x3f0] sm:$0xff]  ;;  %s5535_s22 = smov %s4571_s23 }
 0x2b9   : >> { %1763 = vst [vmem:[%s2632_s27 + $0x5d0] sm:$0xff] %v1762_v57  ;;  %1765 = vst [vmem:[%s2632_s27 + $0x5e8] sm:$0xff] %v1764_v9  ;;  %s5534_s27 = smov %s4574_s8 }
 0x2ba PF: > { %1775 = sbr.rel (%p1622_p10) target bundleno = 808 (0x328), region = 74  ;;  %s1777_s30 = ssub.s32 (!%p1622_p10), %s4495_s19, %s4499_s26 }
 0x2bb   : > { %s4683_s7 = sshrl.u32 (!%p1622_p10), %s4495_s19, 3  ;;  %s4686_s3 = scalar_lea.vmem (!%p1622_p10), %s3350_s9, %s1777_s30 [#allocation6] }
 0x2bc   : > { %s4689_s11 = scalar_lea.vmem (!%p1622_p10), %s4493_s6, %s1777_s30  ;;  %p2259_p1 = scmp.le.s32.totalorder (!%p1622_p10), %s4683_s7, 0 }
 0x2bf   : > { %2160 = sbr.rel (%p2259_p1) target bundleno = 741 (0x2e5), region = 148  ;;  %s5537_s29 = smov (!%p2259_p1), %s4493_s6 }
 0x2c0   : > { %s5538_s21 = smov (!%p2259_p1), %s3350_s9  ;;  %s4698_s14 = smov (!%p2259_p1), 0  }
 0x2c1   : > { %s4700_s16 = smov (!%p2259_p1), 0  }
 0x2c4 LB: >> { %v1793_v6 = vld [vmem:[%s2652_s21] sm:$0xff]  ;;  %v1795_v50 = vld [vmem:[%s2652_s21 + $0x10] sm:$0xff]  ;;  %s1921_s27 = sadd.s32 1, %s2656_s14  ;;  %s1787_s16 = sadd.s32 1, %s2660_s16   ;;  %s2660_s16 = sphi %s4700_s16, %s1787_s16   ;;  %s2656_s14 = sphi %s4698_s14, %s5541_s14   ;;  %s2652_s21 = sphi %s5538_s21, %s5540_s21   ;;  %s2648_s29 = sphi %s5537_s29, %s5539_s29  }
 0x2c5   : >> { %v1797_v31 = vld [vmem:[%s2652_s21 + $0x20] sm:$0xff]  ;;  %1794 = vst [vmem:[%s2648_s29] sm:$0xff] %v1793_v6  ;;  %1796 = vst [vmem:[%s2648_s29 + $0x18] sm:$0xff] %v1795_v50  ;;  %v1799_v49 = vld [vmem:[%s2652_s21 + $0x30] sm:$0xff]  ;;  %p1922_p3 = scmp.ge.s32.totalorder %s1921_s27, %s4683_s7  ;;  %p1786_p7 = scmp.ge.s32.totalorder %s1787_s16, %s4683_s7 }
 0x2c6   : >> { %1798 = vst [vmem:[%s2648_s29 + $0x30] sm:$0xff] %v1797_v31  ;;  %v1801_v13 = vld [vmem:[%s2652_s21 + $0x40] sm:$0xff]  ;;  %v1803_v24 = vld [vmem:[%s2652_s21 + $0x50] sm:$0xff]  ;;  %1800 = vst [vmem:[%s2648_s29 + $0x48] sm:$0xff] %v1799_v49 }
 0x2c7   : >> { %1802 = vst [vmem:[%s2648_s29 + $0x60] sm:$0xff] %v1801_v13  ;;  %1804 = vst [vmem:[%s2648_s29 + $0x78] sm:$0xff] %v1803_v24  ;;  %v1805_v37 = vld [vmem:[%s2652_s21 + $0x60] sm:$0xff]  ;;  %v1807_v48 = vld [vmem:[%s2652_s21 + $0x70] sm:$0xff]  ;;  %s5565_s27 = smov (%p1922_p3, %s1921_s27), 0 }
 0x2c8   : >> { %v1809_v42 = vld [vmem:[%s2652_s21 + $0x80] sm:$0xff]  ;;  %1806 = vst [vmem:[%s2648_s29 + $0x90] sm:$0xff] %v1805_v37  ;;  %1808 = vst [vmem:[%s2648_s29 + $0xa8] sm:$0xff] %v1807_v48  ;;  %v1811_v38 = vld [vmem:[%s2652_s21 + $0x90] sm:$0xff]  ;;  %s2260_s22 = sshll.u32 %s5565_s27, 3  ;;  %s5541_s14 = smov %s5565_s27 }
 0x2c9   : >> { %1810 = vst [vmem:[%s2648_s29 + $0xc0] sm:$0xff] %v1809_v42  ;;  %v1813_v46 = vld [vmem:[%s2652_s21 + $0xa0] sm:$0xff]  ;;  %v1815_v3 = vld [vmem:[%s2652_s21 + $0xb0] sm:$0xff]  ;;  %1812 = vst [vmem:[%s2648_s29 + $0xd8] sm:$0xff] %v1811_v38  ;;  %s4756_s5 = scalar_lea.vmem %s3350_s9, %s2260_s22 [#allocation6]   ;;  %s4759_s4 = scalar_lea.vmem %s4493_s6, %s2260_s22  }
 0x2ca   : >> { %1814 = vst [vmem:[%s2648_s29 + $0xf0] sm:$0xff] %v1813_v46  ;;  %1816 = vst [vmem:[%s2648_s29 + $0x108] sm:$0xff] %v1815_v3  ;;  %v1817_v56 = vld [vmem:[%s2652_s21 + $0xc0] sm:$0xff]  ;;  %v1819_v53 = vld [vmem:[%s2652_s21 + $0xd0] sm:$0xff] }
 0x2cb   : >> { %v1821_v7 = vld [vmem:[%s2652_s21 + $0xe0] sm:$0xff]  ;;  %1818 = vst [vmem:[%s2648_s29 + $0x120] sm:$0xff] %v1817_v56  ;;  %1820 = vst [vmem:[%s2648_s29 + $0x138] sm:$0xff] %v1819_v53  ;;  %v1823_v12 = vld [vmem:[%s2652_s21 + $0xf0] sm:$0xff] }
 0x2cc   : >> { %1822 = vst [vmem:[%s2648_s29 + $0x150] sm:$0xff] %v1821_v7  ;;  %v1825_v17 = vld [vmem:[%s2652_s21 + $0x100] sm:$0xff]  ;;  %v1827_v21 = vld [vmem:[%s2652_s21 + $0x110] sm:$0xff]  ;;  %1824 = vst [vmem:[%s2648_s29 + $0x168] sm:$0xff] %v1823_v12 }
 0x2cd   : >> { %1826 = vst [vmem:[%s2648_s29 + $0x180] sm:$0xff] %v1825_v17  ;;  %1828 = vst [vmem:[%s2648_s29 + $0x198] sm:$0xff] %v1827_v21  ;;  %v1829_v55 = vld [vmem:[%s2652_s21 + $0x120] sm:$0xff]  ;;  %v1831_v27 = vld [vmem:[%s2652_s21 + $0x130] sm:$0xff] }
 0x2ce   : >> { %v1833_v29 = vld [vmem:[%s2652_s21 + $0x140] sm:$0xff]  ;;  %1830 = vst [vmem:[%s2648_s29 + $0x1b0] sm:$0xff] %v1829_v55  ;;  %1832 = vst [vmem:[%s2648_s29 + $0x1c8] sm:$0xff] %v1831_v27  ;;  %v1835_v15 = vld [vmem:[%s2652_s21 + $0x150] sm:$0xff] }
 0x2cf   : >> { %1834 = vst [vmem:[%s2648_s29 + $0x1e0] sm:$0xff] %v1833_v29  ;;  %v1837_v4 = vld [vmem:[%s2652_s21 + $0x160] sm:$0xff]  ;;  %v1839_v16 = vld [vmem:[%s2652_s21 + $0x170] sm:$0xff]  ;;  %1836 = vst [vmem:[%s2648_s29 + $0x1f8] sm:$0xff] %v1835_v15 }
 0x2d0   : >> { %1838 = vst [vmem:[%s2648_s29 + $0x210] sm:$0xff] %v1837_v4  ;;  %1840 = vst [vmem:[%s2648_s29 + $0x228] sm:$0xff] %v1839_v16  ;;  %v1841_v43 = vld [vmem:[%s2652_s21 + $0x180] sm:$0xff]  ;;  %v1843_v25 = vld [vmem:[%s2652_s21 + $0x190] sm:$0xff] }
 0x2d1   : >> { %v1845_v5 = vld [vmem:[%s2652_s21 + $0x1a0] sm:$0xff]  ;;  %1842 = vst [vmem:[%s2648_s29 + $0x240] sm:$0xff] %v1841_v43  ;;  %1844 = vst [vmem:[%s2648_s29 + $0x258] sm:$0xff] %v1843_v25  ;;  %v1847_v35 = vld [vmem:[%s2652_s21 + $0x1b0] sm:$0xff] }
 0x2d2   : >> { %1846 = vst [vmem:[%s2648_s29 + $0x270] sm:$0xff] %v1845_v5  ;;  %v1849_v58 = vld [vmem:[%s2652_s21 + $0x1c0] sm:$0xff]  ;;  %v1851_v52 = vld [vmem:[%s2652_s21 + $0x1d0] sm:$0xff]  ;;  %1848 = vst [vmem:[%s2648_s29 + $0x288] sm:$0xff] %v1847_v35 }
 0x2d3   : >> { %1850 = vst [vmem:[%s2648_s29 + $0x2a0] sm:$0xff] %v1849_v58  ;;  %1852 = vst [vmem:[%s2648_s29 + $0x2b8] sm:$0xff] %v1851_v52  ;;  %v1853_v32 = vld [vmem:[%s2652_s21 + $0x1e0] sm:$0xff]  ;;  %v1855_v40 = vld [vmem:[%s2652_s21 + $0x1f0] sm:$0xff] }
 0x2d4   : >> { %v1857_v62 = vld [vmem:[%s2652_s21 + $0x200] sm:$0xff]  ;;  %1854 = vst [vmem:[%s2648_s29 + $0x2d0] sm:$0xff] %v1853_v32  ;;  %1856 = vst [vmem:[%s2648_s29 + $0x2e8] sm:$0xff] %v1855_v40  ;;  %v1859_v51 = vld [vmem:[%s2652_s21 + $0x210] sm:$0xff] }
 0x2d5   : >> { %1858 = vst [vmem:[%s2648_s29 + $0x300] sm:$0xff] %v1857_v62  ;;  %v1861_v10 = vld [vmem:[%s2652_s21 + $0x220] sm:$0xff]  ;;  %v1863_v44 = vld [vmem:[%s2652_s21 + $0x230] sm:$0xff]  ;;  %1860 = vst [vmem:[%s2648_s29 + $0x318] sm:$0xff] %v1859_v51 }
 0x2d6   : >> { %1862 = vst [vmem:[%s2648_s29 + $0x330] sm:$0xff] %v1861_v10  ;;  %1864 = vst [vmem:[%s2648_s29 + $0x348] sm:$0xff] %v1863_v44  ;;  %v1865_v26 = vld [vmem:[%s2652_s21 + $0x240] sm:$0xff]  ;;  %v1867_v60 = vld [vmem:[%s2652_s21 + $0x250] sm:$0xff] }
 0x2d7   : >> { %v1869_v36 = vld [vmem:[%s2652_s21 + $0x260] sm:$0xff]  ;;  %1866 = vst [vmem:[%s2648_s29 + $0x360] sm:$0xff] %v1865_v26  ;;  %1868 = vst [vmem:[%s2648_s29 + $0x378] sm:$0xff] %v1867_v60  ;;  %v1871_v33 = vld [vmem:[%s2652_s21 + $0x270] sm:$0xff] }
 0x2d8   : >> { %1870 = vst [vmem:[%s2648_s29 + $0x390] sm:$0xff] %v1869_v36  ;;  %v1873_v2 = vld [vmem:[%s2652_s21 + $0x280] sm:$0xff]  ;;  %v1875_v63 = vld [vmem:[%s2652_s21 + $0x290] sm:$0xff]  ;;  %1872 = vst [vmem:[%s2648_s29 + $0x3a8] sm:$0xff] %v1871_v33 }
 0x2d9   : >> { %1874 = vst [vmem:[%s2648_s29 + $0x3c0] sm:$0xff] %v1873_v2  ;;  %1876 = vst [vmem:[%s2648_s29 + $0x3d8] sm:$0xff] %v1875_v63  ;;  %v1877_v8 = vld [vmem:[%s2652_s21 + $0x2a0] sm:$0xff]  ;;  %v1879_v14 = vld [vmem:[%s2652_s21 + $0x2b0] sm:$0xff] }
 0x2da   : >> { %v1881_v1 = vld [vmem:[%s2652_s21 + $0x2c0] sm:$0xff]  ;;  %1878 = vst [vmem:[%s2648_s29 + $0x3f0] sm:$0xff] %v1877_v8  ;;  %1880 = vst [vmem:[%s2648_s29 + $0x408] sm:$0xff] %v1879_v14  ;;  %v1883_v19 = vld [vmem:[%s2652_s21 + $0x2d0] sm:$0xff] }
 0x2db   : >> { %1882 = vst [vmem:[%s2648_s29 + $0x420] sm:$0xff] %v1881_v1  ;;  %v1885_v45 = vld [vmem:[%s2652_s21 + $0x2e0] sm:$0xff]  ;;  %v1887_v0 = vld [vmem:[%s2652_s21 + $0x2f0] sm:$0xff]  ;;  %1884 = vst [vmem:[%s2648_s29 + $0x438] sm:$0xff] %v1883_v19 }
 0x2dc   : >> { %1886 = vst [vmem:[%s2648_s29 + $0x450] sm:$0xff] %v1885_v45  ;;  %1888 = vst [vmem:[%s2648_s29 + $0x468] sm:$0xff] %v1887_v0  ;;  %v1889_v59 = vld [vmem:[%s2652_s21 + $0x300] sm:$0xff]  ;;  %v1891_v34 = vld [vmem:[%s2652_s21 + $0x310] sm:$0xff] }
 0x2dd   : >> { %v1893_v18 = vld [vmem:[%s2652_s21 + $0x320] sm:$0xff]  ;;  %1890 = vst [vmem:[%s2648_s29 + $0x480] sm:$0xff] %v1889_v59  ;;  %1892 = vst [vmem:[%s2648_s29 + $0x498] sm:$0xff] %v1891_v34  ;;  %v1895_v39 = vld [vmem:[%s2652_s21 + $0x330] sm:$0xff] }
 0x2de   : >> { %1894 = vst [vmem:[%s2648_s29 + $0x4b0] sm:$0xff] %v1893_v18  ;;  %v1897_v11 = vld [vmem:[%s2652_s21 + $0x340] sm:$0xff]  ;;  %v1899_v20 = vld [vmem:[%s2652_s21 + $0x350] sm:$0xff]  ;;  %1896 = vst [vmem:[%s2648_s29 + $0x4c8] sm:$0xff] %v1895_v39 }
 0x2df   : >> { %1898 = vst [vmem:[%s2648_s29 + $0x4e0] sm:$0xff] %v1897_v11  ;;  %1900 = vst [vmem:[%s2648_s29 + $0x4f8] sm:$0xff] %v1899_v20  ;;  %v1901_v41 = vld [vmem:[%s2652_s21 + $0x360] sm:$0xff]  ;;  %v1903_v47 = vld [vmem:[%s2652_s21 + $0x370] sm:$0xff] }
 0x2e0   : >> { %v1905_v23 = vld [vmem:[%s2652_s21 + $0x380] sm:$0xff]  ;;  %1902 = vst [vmem:[%s2648_s29 + $0x510] sm:$0xff] %v1901_v41  ;;  %1904 = vst [vmem:[%s2648_s29 + $0x528] sm:$0xff] %v1903_v47  ;;  %v1907_v30 = vld [vmem:[%s2652_s21 + $0x390] sm:$0xff]  ;;  %1789 = sbr.rel (!%p1786_p7) target bundleno = 708 (0x2c4), region = 154 }
 0x2e1   : >> { %1906 = vst [vmem:[%s2648_s29 + $0x540] sm:$0xff] %v1905_v23  ;;  %v1909_v61 = vld [vmem:[%s2652_s21 + $0x3a0] sm:$0xff]  ;;  %v1911_v28 = vld [vmem:[%s2652_s21 + $0x3b0] sm:$0xff]  ;;  %1908 = vst [vmem:[%s2648_s29 + $0x558] sm:$0xff] %v1907_v30 }
 0x2e2   : >> { %1910 = vst [vmem:[%s2648_s29 + $0x570] sm:$0xff] %v1909_v61  ;;  %1912 = vst [vmem:[%s2648_s29 + $0x588] sm:$0xff] %v1911_v28  ;;  %v1913_v22 = vld [vmem:[%s2652_s21 + $0x3c0] sm:$0xff]  ;;  %v1915_v54 = vld [vmem:[%s2652_s21 + $0x3d0] sm:$0xff] }
 0x2e3   : >> { %v1917_v57 = vld [vmem:[%s2652_s21 + $0x3e0] sm:$0xff]  ;;  %1914 = vst [vmem:[%s2648_s29 + $0x5a0] sm:$0xff] %v1913_v22  ;;  %1916 = vst [vmem:[%s2648_s29 + $0x5b8] sm:$0xff] %v1915_v54  ;;  %v1919_v9 = vld [vmem:[%s2652_s21 + $0x3f0] sm:$0xff]  ;;  %s5540_s21 = smov %s4756_s5 }
 0x2e4   : >> { %1918 = vst [vmem:[%s2648_s29 + $0x5d0] sm:$0xff] %v1917_v57  ;;  %1920 = vst [vmem:[%s2648_s29 + $0x5e8] sm:$0xff] %v1919_v9  ;;  %s5539_s29 = smov %s4759_s4 }
 0x2e5 PF: > { %s2669_s0 = smov 1  }
 0x2e6   : > { %s1928_s28 = sshll.u32 %s2669_s0, %s4499_s26 }
 0x2e7   : > { %s4864_s23 = sadd.s32 4294967295, %s1928_s28 }
 0x2e8   : > { %v1938_v6 = vld [vmem:[%s4686_s3] sm:%s4864_s23]  ;;  %v1940_v50 = vld [vmem:[%s4686_s3 + $0x10] sm:%s4864_s23] }
 0x2e9   : > { %1939 = vst [vmem:[%s4689_s11] sm:%s4864_s23] %v1938_v6  ;;  %1941 = vst [vmem:[%s4689_s11 + $0x18] sm:%s4864_s23] %v1940_v50 }
 0x2ea   : > { %v1942_v31 = vld [vmem:[%s4686_s3 + $0x20] sm:%s4864_s23]  ;;  %v1944_v49 = vld [vmem:[%s4686_s3 + $0x30] sm:%s4864_s23] }
 0x2eb   : > { %1943 = vst [vmem:[%s4689_s11 + $0x30] sm:%s4864_s23] %v1942_v31  ;;  %1945 = vst [vmem:[%s4689_s11 + $0x48] sm:%s4864_s23] %v1944_v49 }
 0x2ec   : > { %v1946_v13 = vld [vmem:[%s4686_s3 + $0x40] sm:%s4864_s23]  ;;  %v1948_v24 = vld [vmem:[%s4686_s3 + $0x50] sm:%s4864_s23] }
 0x2ed   : > { %1947 = vst [vmem:[%s4689_s11 + $0x60] sm:%s4864_s23] %v1946_v13  ;;  %1949 = vst [vmem:[%s4689_s11 + $0x78] sm:%s4864_s23] %v1948_v24 }
 0x2ee   : > { %v1950_v37 = vld [vmem:[%s4686_s3 + $0x60] sm:%s4864_s23]  ;;  %v1952_v48 = vld [vmem:[%s4686_s3 + $0x70] sm:%s4864_s23] }
 0x2ef   : > { %1951 = vst [vmem:[%s4689_s11 + $0x90] sm:%s4864_s23] %v1950_v37  ;;  %1953 = vst [vmem:[%s4689_s11 + $0xa8] sm:%s4864_s23] %v1952_v48 }
 0x2f0   : > { %v1954_v42 = vld [vmem:[%s4686_s3 + $0x80] sm:%s4864_s23]  ;;  %v1956_v38 = vld [vmem:[%s4686_s3 + $0x90] sm:%s4864_s23] }
 0x2f1   : > { %1955 = vst [vmem:[%s4689_s11 + $0xc0] sm:%s4864_s23] %v1954_v42  ;;  %1957 = vst [vmem:[%s4689_s11 + $0xd8] sm:%s4864_s23] %v1956_v38 }
 0x2f2   : > { %v1958_v46 = vld [vmem:[%s4686_s3 + $0xa0] sm:%s4864_s23]  ;;  %v1960_v3 = vld [vmem:[%s4686_s3 + $0xb0] sm:%s4864_s23] }
 0x2f3   : > { %1959 = vst [vmem:[%s4689_s11 + $0xf0] sm:%s4864_s23] %v1958_v46  ;;  %1961 = vst [vmem:[%s4689_s11 + $0x108] sm:%s4864_s23] %v1960_v3 }
 0x2f4   : > { %v1962_v56 = vld [vmem:[%s4686_s3 + $0xc0] sm:%s4864_s23]  ;;  %v1964_v53 = vld [vmem:[%s4686_s3 + $0xd0] sm:%s4864_s23] }
 0x2f5   : > { %1963 = vst [vmem:[%s4689_s11 + $0x120] sm:%s4864_s23] %v1962_v56  ;;  %1965 = vst [vmem:[%s4689_s11 + $0x138] sm:%s4864_s23] %v1964_v53 }
 0x2f6   : > { %v1966_v7 = vld [vmem:[%s4686_s3 + $0xe0] sm:%s4864_s23]  ;;  %v1968_v12 = vld [vmem:[%s4686_s3 + $0xf0] sm:%s4864_s23] }
 0x2f7   : > { %1967 = vst [vmem:[%s4689_s11 + $0x150] sm:%s4864_s23] %v1966_v7  ;;  %1969 = vst [vmem:[%s4689_s11 + $0x168] sm:%s4864_s23] %v1968_v12 }
 0x2f8   : > { %v1970_v17 = vld [vmem:[%s4686_s3 + $0x100] sm:%s4864_s23]  ;;  %v1972_v21 = vld [vmem:[%s4686_s3 + $0x110] sm:%s4864_s23] }
 0x2f9   : > { %1971 = vst [vmem:[%s4689_s11 + $0x180] sm:%s4864_s23] %v1970_v17  ;;  %1973 = vst [vmem:[%s4689_s11 + $0x198] sm:%s4864_s23] %v1972_v21 }
 0x2fa   : > { %v1974_v55 = vld [vmem:[%s4686_s3 + $0x120] sm:%s4864_s23]  ;;  %v1976_v27 = vld [vmem:[%s4686_s3 + $0x130] sm:%s4864_s23] }
 0x2fb   : > { %1975 = vst [vmem:[%s4689_s11 + $0x1b0] sm:%s4864_s23] %v1974_v55  ;;  %1977 = vst [vmem:[%s4689_s11 + $0x1c8] sm:%s4864_s23] %v1976_v27 }
 0x2fc   : > { %v1978_v29 = vld [vmem:[%s4686_s3 + $0x140] sm:%s4864_s23]  ;;  %v1980_v15 = vld [vmem:[%s4686_s3 + $0x150] sm:%s4864_s23] }
 0x2fd   : > { %1979 = vst [vmem:[%s4689_s11 + $0x1e0] sm:%s4864_s23] %v1978_v29  ;;  %1981 = vst [vmem:[%s4689_s11 + $0x1f8] sm:%s4864_s23] %v1980_v15 }
 0x2fe   : > { %v1982_v4 = vld [vmem:[%s4686_s3 + $0x160] sm:%s4864_s23]  ;;  %v1984_v16 = vld [vmem:[%s4686_s3 + $0x170] sm:%s4864_s23] }
 0x2ff   : > { %1983 = vst [vmem:[%s4689_s11 + $0x210] sm:%s4864_s23] %v1982_v4  ;;  %1985 = vst [vmem:[%s4689_s11 + $0x228] sm:%s4864_s23] %v1984_v16 }
 0x300   : > { %v1986_v43 = vld [vmem:[%s4686_s3 + $0x180] sm:%s4864_s23]  ;;  %v1988_v25 = vld [vmem:[%s4686_s3 + $0x190] sm:%s4864_s23] }
 0x301   : > { %1987 = vst [vmem:[%s4689_s11 + $0x240] sm:%s4864_s23] %v1986_v43  ;;  %1989 = vst [vmem:[%s4689_s11 + $0x258] sm:%s4864_s23] %v1988_v25 }
 0x302   : > { %v1990_v5 = vld [vmem:[%s4686_s3 + $0x1a0] sm:%s4864_s23]  ;;  %v1992_v35 = vld [vmem:[%s4686_s3 + $0x1b0] sm:%s4864_s23] }
 0x303   : > { %1991 = vst [vmem:[%s4689_s11 + $0x270] sm:%s4864_s23] %v1990_v5  ;;  %1993 = vst [vmem:[%s4689_s11 + $0x288] sm:%s4864_s23] %v1992_v35 }
 0x304   : > { %v1994_v58 = vld [vmem:[%s4686_s3 + $0x1c0] sm:%s4864_s23]  ;;  %v1996_v52 = vld [vmem:[%s4686_s3 + $0x1d0] sm:%s4864_s23] }
 0x305   : > { %1995 = vst [vmem:[%s4689_s11 + $0x2a0] sm:%s4864_s23] %v1994_v58  ;;  %1997 = vst [vmem:[%s4689_s11 + $0x2b8] sm:%s4864_s23] %v1996_v52 }
 0x306   : > { %v1998_v32 = vld [vmem:[%s4686_s3 + $0x1e0] sm:%s4864_s23]  ;;  %v2000_v40 = vld [vmem:[%s4686_s3 + $0x1f0] sm:%s4864_s23] }
 0x307   : > { %1999 = vst [vmem:[%s4689_s11 + $0x2d0] sm:%s4864_s23] %v1998_v32  ;;  %2001 = vst [vmem:[%s4689_s11 + $0x2e8] sm:%s4864_s23] %v2000_v40 }
 0x308   : > { %v2002_v62 = vld [vmem:[%s4686_s3 + $0x200] sm:%s4864_s23]  ;;  %v2004_v51 = vld [vmem:[%s4686_s3 + $0x210] sm:%s4864_s23] }
 0x309   : > { %2003 = vst [vmem:[%s4689_s11 + $0x300] sm:%s4864_s23] %v2002_v62  ;;  %2005 = vst [vmem:[%s4689_s11 + $0x318] sm:%s4864_s23] %v2004_v51 }
 0x30a   : > { %v2006_v10 = vld [vmem:[%s4686_s3 + $0x220] sm:%s4864_s23]  ;;  %v2008_v44 = vld [vmem:[%s4686_s3 + $0x230] sm:%s4864_s23] }
 0x30b   : > { %2007 = vst [vmem:[%s4689_s11 + $0x330] sm:%s4864_s23] %v2006_v10  ;;  %2009 = vst [vmem:[%s4689_s11 + $0x348] sm:%s4864_s23] %v2008_v44 }
 0x30c   : > { %v2010_v26 = vld [vmem:[%s4686_s3 + $0x240] sm:%s4864_s23]  ;;  %v2012_v60 = vld [vmem:[%s4686_s3 + $0x250] sm:%s4864_s23] }
 0x30d   : > { %2011 = vst [vmem:[%s4689_s11 + $0x360] sm:%s4864_s23] %v2010_v26  ;;  %2013 = vst [vmem:[%s4689_s11 + $0x378] sm:%s4864_s23] %v2012_v60 }
 0x30e   : > { %v2014_v36 = vld [vmem:[%s4686_s3 + $0x260] sm:%s4864_s23]  ;;  %v2016_v33 = vld [vmem:[%s4686_s3 + $0x270] sm:%s4864_s23] }
 0x30f   : > { %2015 = vst [vmem:[%s4689_s11 + $0x390] sm:%s4864_s23] %v2014_v36  ;;  %2017 = vst [vmem:[%s4689_s11 + $0x3a8] sm:%s4864_s23] %v2016_v33 }
 0x310   : > { %v2018_v2 = vld [vmem:[%s4686_s3 + $0x280] sm:%s4864_s23]  ;;  %v2020_v63 = vld [vmem:[%s4686_s3 + $0x290] sm:%s4864_s23] }
 0x311   : > { %2019 = vst [vmem:[%s4689_s11 + $0x3c0] sm:%s4864_s23] %v2018_v2  ;;  %2021 = vst [vmem:[%s4689_s11 + $0x3d8] sm:%s4864_s23] %v2020_v63 }
 0x312   : > { %v2022_v8 = vld [vmem:[%s4686_s3 + $0x2a0] sm:%s4864_s23]  ;;  %v2024_v14 = vld [vmem:[%s4686_s3 + $0x2b0] sm:%s4864_s23] }
 0x313   : > { %2023 = vst [vmem:[%s4689_s11 + $0x3f0] sm:%s4864_s23] %v2022_v8  ;;  %2025 = vst [vmem:[%s4689_s11 + $0x408] sm:%s4864_s23] %v2024_v14 }
 0x314   : > { %v2026_v1 = vld [vmem:[%s4686_s3 + $0x2c0] sm:%s4864_s23]  ;;  %v2028_v19 = vld [vmem:[%s4686_s3 + $0x2d0] sm:%s4864_s23] }
 0x315   : > { %2027 = vst [vmem:[%s4689_s11 + $0x420] sm:%s4864_s23] %v2026_v1  ;;  %2029 = vst [vmem:[%s4689_s11 + $0x438] sm:%s4864_s23] %v2028_v19 }
 0x316   : > { %v2030_v45 = vld [vmem:[%s4686_s3 + $0x2e0] sm:%s4864_s23]  ;;  %v2032_v0 = vld [vmem:[%s4686_s3 + $0x2f0] sm:%s4864_s23] }
 0x317   : > { %2031 = vst [vmem:[%s4689_s11 + $0x450] sm:%s4864_s23] %v2030_v45  ;;  %2033 = vst [vmem:[%s4689_s11 + $0x468] sm:%s4864_s23] %v2032_v0 }
 0x318   : > { %v2034_v59 = vld [vmem:[%s4686_s3 + $0x300] sm:%s4864_s23]  ;;  %v2036_v34 = vld [vmem:[%s4686_s3 + $0x310] sm:%s4864_s23] }
 0x319   : > { %2035 = vst [vmem:[%s4689_s11 + $0x480] sm:%s4864_s23] %v2034_v59  ;;  %2037 = vst [vmem:[%s4689_s11 + $0x498] sm:%s4864_s23] %v2036_v34 }
 0x31a   : > { %v2038_v18 = vld [vmem:[%s4686_s3 + $0x320] sm:%s4864_s23]  ;;  %v2040_v39 = vld [vmem:[%s4686_s3 + $0x330] sm:%s4864_s23] }
 0x31b   : > { %2039 = vst [vmem:[%s4689_s11 + $0x4b0] sm:%s4864_s23] %v2038_v18  ;;  %2041 = vst [vmem:[%s4689_s11 + $0x4c8] sm:%s4864_s23] %v2040_v39 }
 0x31c   : > { %v2042_v11 = vld [vmem:[%s4686_s3 + $0x340] sm:%s4864_s23]  ;;  %v2044_v20 = vld [vmem:[%s4686_s3 + $0x350] sm:%s4864_s23] }
 0x31d   : > { %2043 = vst [vmem:[%s4689_s11 + $0x4e0] sm:%s4864_s23] %v2042_v11  ;;  %2045 = vst [vmem:[%s4689_s11 + $0x4f8] sm:%s4864_s23] %v2044_v20 }
 0x31e   : > { %v2046_v41 = vld [vmem:[%s4686_s3 + $0x360] sm:%s4864_s23]  ;;  %v2048_v47 = vld [vmem:[%s4686_s3 + $0x370] sm:%s4864_s23] }
 0x31f   : > { %2047 = vst [vmem:[%s4689_s11 + $0x510] sm:%s4864_s23] %v2046_v41  ;;  %2049 = vst [vmem:[%s4689_s11 + $0x528] sm:%s4864_s23] %v2048_v47 }
 0x320   : > { %v2050_v23 = vld [vmem:[%s4686_s3 + $0x380] sm:%s4864_s23]  ;;  %v2052_v30 = vld [vmem:[%s4686_s3 + $0x390] sm:%s4864_s23] }
 0x321   : > { %2051 = vst [vmem:[%s4689_s11 + $0x540] sm:%s4864_s23] %v2050_v23  ;;  %2053 = vst [vmem:[%s4689_s11 + $0x558] sm:%s4864_s23] %v2052_v30 }
 0x322   : > { %v2054_v61 = vld [vmem:[%s4686_s3 + $0x3a0] sm:%s4864_s23]  ;;  %v2056_v28 = vld [vmem:[%s4686_s3 + $0x3b0] sm:%s4864_s23] }
 0x323   : > { %2055 = vst [vmem:[%s4689_s11 + $0x570] sm:%s4864_s23] %v2054_v61  ;;  %2057 = vst [vmem:[%s4689_s11 + $0x588] sm:%s4864_s23] %v2056_v28 }
 0x324   : > { %v2058_v22 = vld [vmem:[%s4686_s3 + $0x3c0] sm:%s4864_s23]  ;;  %v2060_v54 = vld [vmem:[%s4686_s3 + $0x3d0] sm:%s4864_s23] }
 0x325   : > { %2059 = vst [vmem:[%s4689_s11 + $0x5a0] sm:%s4864_s23] %v2058_v22  ;;  %2061 = vst [vmem:[%s4689_s11 + $0x5b8] sm:%s4864_s23] %v2060_v54 }
 0x326   : > { %v2062_v57 = vld [vmem:[%s4686_s3 + $0x3e0] sm:%s4864_s23]  ;;  %v2064_v9 = vld [vmem:[%s4686_s3 + $0x3f0] sm:%s4864_s23] }
 0x327   : > { %2063 = vst [vmem:[%s4689_s11 + $0x5d0] sm:%s4864_s23] %v2062_v57  ;;  %2065 = vst [vmem:[%s4689_s11 + $0x5e8] sm:%s4864_s23] %v2064_v9 }
 0x328 PF: > { %p2263_p8 = scmp.ge.u32.totalorder %s4495_s19, 8 }
 0x329   : > { %s2670_s26 = smov (!%p2263_p8), 1  }
 0x32a   : > { %1482 = sbr.rel (%p2263_p8) target bundleno = 879 (0x36f), region = 52  ;;  %s1483_s8 = sshll.u32 (!%p2263_p8), %s2670_s26, %s4495_s19 }
 0x32b   : > { %s5124_s30 = sadd.s32 (!%p2263_p8), 4294967295, %s1483_s8 }
 0x32f   : > { %v1493_v6 = vld [vmem:[%s3350_s9] sm:%s5124_s30]  ;;  %v1495_v50 = vld [vmem:[%s3350_s9 + $0x10] sm:%s5124_s30] }
 0x330   : > { %1494 = vst [vmem:[%s4493_s6] sm:%s5124_s30] %v1493_v6  ;;  %1496 = vst [vmem:[%s4493_s6 + $0x18] sm:%s5124_s30] %v1495_v50 }
 0x331   : > { %v1497_v31 = vld [vmem:[%s3350_s9 + $0x20] sm:%s5124_s30]  ;;  %v1499_v49 = vld [vmem:[%s3350_s9 + $0x30] sm:%s5124_s30] }
 0x332   : > { %1498 = vst [vmem:[%s4493_s6 + $0x30] sm:%s5124_s30] %v1497_v31  ;;  %1500 = vst [vmem:[%s4493_s6 + $0x48] sm:%s5124_s30] %v1499_v49 }
 0x333   : > { %v1501_v13 = vld [vmem:[%s3350_s9 + $0x40] sm:%s5124_s30]  ;;  %v1503_v24 = vld [vmem:[%s3350_s9 + $0x50] sm:%s5124_s30] }
 0x334   : > { %1502 = vst [vmem:[%s4493_s6 + $0x60] sm:%s5124_s30] %v1501_v13  ;;  %1504 = vst [vmem:[%s4493_s6 + $0x78] sm:%s5124_s30] %v1503_v24 }
 0x335   : > { %v1505_v37 = vld [vmem:[%s3350_s9 + $0x60] sm:%s5124_s30]  ;;  %v1507_v48 = vld [vmem:[%s3350_s9 + $0x70] sm:%s5124_s30] }
 0x336   : > { %1506 = vst [vmem:[%s4493_s6 + $0x90] sm:%s5124_s30] %v1505_v37  ;;  %1508 = vst [vmem:[%s4493_s6 + $0xa8] sm:%s5124_s30] %v1507_v48 }
 0x337   : > { %v1509_v42 = vld [vmem:[%s3350_s9 + $0x80] sm:%s5124_s30]  ;;  %v1511_v38 = vld [vmem:[%s3350_s9 + $0x90] sm:%s5124_s30] }
 0x338   : > { %1510 = vst [vmem:[%s4493_s6 + $0xc0] sm:%s5124_s30] %v1509_v42  ;;  %1512 = vst [vmem:[%s4493_s6 + $0xd8] sm:%s5124_s30] %v1511_v38 }
 0x339   : > { %v1513_v46 = vld [vmem:[%s3350_s9 + $0xa0] sm:%s5124_s30]  ;;  %v1515_v3 = vld [vmem:[%s3350_s9 + $0xb0] sm:%s5124_s30] }
 0x33a   : > { %1514 = vst [vmem:[%s4493_s6 + $0xf0] sm:%s5124_s30] %v1513_v46  ;;  %1516 = vst [vmem:[%s4493_s6 + $0x108] sm:%s5124_s30] %v1515_v3 }
 0x33b   : > { %v1517_v56 = vld [vmem:[%s3350_s9 + $0xc0] sm:%s5124_s30]  ;;  %v1519_v53 = vld [vmem:[%s3350_s9 + $0xd0] sm:%s5124_s30] }
 0x33c   : > { %1518 = vst [vmem:[%s4493_s6 + $0x120] sm:%s5124_s30] %v1517_v56  ;;  %1520 = vst [vmem:[%s4493_s6 + $0x138] sm:%s5124_s30] %v1519_v53 }
 0x33d   : > { %v1521_v7 = vld [vmem:[%s3350_s9 + $0xe0] sm:%s5124_s30]  ;;  %v1523_v12 = vld [vmem:[%s3350_s9 + $0xf0] sm:%s5124_s30] }
 0x33e   : > { %1522 = vst [vmem:[%s4493_s6 + $0x150] sm:%s5124_s30] %v1521_v7  ;;  %1524 = vst [vmem:[%s4493_s6 + $0x168] sm:%s5124_s30] %v1523_v12 }
 0x33f   : > { %v1525_v17 = vld [vmem:[%s3350_s9 + $0x100] sm:%s5124_s30]  ;;  %v1527_v21 = vld [vmem:[%s3350_s9 + $0x110] sm:%s5124_s30] }
 0x340   : > { %1526 = vst [vmem:[%s4493_s6 + $0x180] sm:%s5124_s30] %v1525_v17  ;;  %1528 = vst [vmem:[%s4493_s6 + $0x198] sm:%s5124_s30] %v1527_v21 }
 0x341   : > { %v1529_v55 = vld [vmem:[%s3350_s9 + $0x120] sm:%s5124_s30]  ;;  %v1531_v27 = vld [vmem:[%s3350_s9 + $0x130] sm:%s5124_s30] }
 0x342   : > { %1530 = vst [vmem:[%s4493_s6 + $0x1b0] sm:%s5124_s30] %v1529_v55  ;;  %1532 = vst [vmem:[%s4493_s6 + $0x1c8] sm:%s5124_s30] %v1531_v27 }
 0x343   : > { %v1533_v29 = vld [vmem:[%s3350_s9 + $0x140] sm:%s5124_s30]  ;;  %v1535_v15 = vld [vmem:[%s3350_s9 + $0x150] sm:%s5124_s30] }
 0x344   : > { %1534 = vst [vmem:[%s4493_s6 + $0x1e0] sm:%s5124_s30] %v1533_v29  ;;  %1536 = vst [vmem:[%s4493_s6 + $0x1f8] sm:%s5124_s30] %v1535_v15 }
 0x345   : > { %v1537_v4 = vld [vmem:[%s3350_s9 + $0x160] sm:%s5124_s30]  ;;  %v1539_v16 = vld [vmem:[%s3350_s9 + $0x170] sm:%s5124_s30] }
 0x346   : > { %1538 = vst [vmem:[%s4493_s6 + $0x210] sm:%s5124_s30] %v1537_v4  ;;  %1540 = vst [vmem:[%s4493_s6 + $0x228] sm:%s5124_s30] %v1539_v16 }
 0x347   : > { %v1541_v43 = vld [vmem:[%s3350_s9 + $0x180] sm:%s5124_s30]  ;;  %v1543_v25 = vld [vmem:[%s3350_s9 + $0x190] sm:%s5124_s30] }
 0x348   : > { %1542 = vst [vmem:[%s4493_s6 + $0x240] sm:%s5124_s30] %v1541_v43  ;;  %1544 = vst [vmem:[%s4493_s6 + $0x258] sm:%s5124_s30] %v1543_v25 }
 0x349   : > { %v1545_v5 = vld [vmem:[%s3350_s9 + $0x1a0] sm:%s5124_s30]  ;;  %v1547_v35 = vld [vmem:[%s3350_s9 + $0x1b0] sm:%s5124_s30] }
 0x34a   : > { %1546 = vst [vmem:[%s4493_s6 + $0x270] sm:%s5124_s30] %v1545_v5  ;;  %1548 = vst [vmem:[%s4493_s6 + $0x288] sm:%s5124_s30] %v1547_v35 }
 0x34b   : > { %v1549_v58 = vld [vmem:[%s3350_s9 + $0x1c0] sm:%s5124_s30]  ;;  %v1551_v52 = vld [vmem:[%s3350_s9 + $0x1d0] sm:%s5124_s30] }
 0x34c   : > { %1550 = vst [vmem:[%s4493_s6 + $0x2a0] sm:%s5124_s30] %v1549_v58  ;;  %1552 = vst [vmem:[%s4493_s6 + $0x2b8] sm:%s5124_s30] %v1551_v52 }
 0x34d   : > { %v1553_v32 = vld [vmem:[%s3350_s9 + $0x1e0] sm:%s5124_s30]  ;;  %v1555_v40 = vld [vmem:[%s3350_s9 + $0x1f0] sm:%s5124_s30] }
 0x34e   : > { %1554 = vst [vmem:[%s4493_s6 + $0x2d0] sm:%s5124_s30] %v1553_v32  ;;  %1556 = vst [vmem:[%s4493_s6 + $0x2e8] sm:%s5124_s30] %v1555_v40 }
 0x34f   : > { %v1557_v62 = vld [vmem:[%s3350_s9 + $0x200] sm:%s5124_s30]  ;;  %v1559_v51 = vld [vmem:[%s3350_s9 + $0x210] sm:%s5124_s30] }
 0x350   : > { %1558 = vst [vmem:[%s4493_s6 + $0x300] sm:%s5124_s30] %v1557_v62  ;;  %1560 = vst [vmem:[%s4493_s6 + $0x318] sm:%s5124_s30] %v1559_v51 }
 0x351   : > { %v1561_v10 = vld [vmem:[%s3350_s9 + $0x220] sm:%s5124_s30]  ;;  %v1563_v44 = vld [vmem:[%s3350_s9 + $0x230] sm:%s5124_s30] }
 0x352   : > { %1562 = vst [vmem:[%s4493_s6 + $0x330] sm:%s5124_s30] %v1561_v10  ;;  %1564 = vst [vmem:[%s4493_s6 + $0x348] sm:%s5124_s30] %v1563_v44 }
 0x353   : > { %v1565_v26 = vld [vmem:[%s3350_s9 + $0x240] sm:%s5124_s30]  ;;  %v1567_v60 = vld [vmem:[%s3350_s9 + $0x250] sm:%s5124_s30] }
 0x354   : > { %1566 = vst [vmem:[%s4493_s6 + $0x360] sm:%s5124_s30] %v1565_v26  ;;  %1568 = vst [vmem:[%s4493_s6 + $0x378] sm:%s5124_s30] %v1567_v60 }
 0x355   : > { %v1569_v36 = vld [vmem:[%s3350_s9 + $0x260] sm:%s5124_s30]  ;;  %v1571_v33 = vld [vmem:[%s3350_s9 + $0x270] sm:%s5124_s30] }
 0x356   : > { %1570 = vst [vmem:[%s4493_s6 + $0x390] sm:%s5124_s30] %v1569_v36  ;;  %1572 = vst [vmem:[%s4493_s6 + $0x3a8] sm:%s5124_s30] %v1571_v33 }
 0x357   : > { %v1573_v2 = vld [vmem:[%s3350_s9 + $0x280] sm:%s5124_s30]  ;;  %v1575_v63 = vld [vmem:[%s3350_s9 + $0x290] sm:%s5124_s30] }
 0x358   : > { %1574 = vst [vmem:[%s4493_s6 + $0x3c0] sm:%s5124_s30] %v1573_v2  ;;  %1576 = vst [vmem:[%s4493_s6 + $0x3d8] sm:%s5124_s30] %v1575_v63 }
 0x359   : > { %v1577_v8 = vld [vmem:[%s3350_s9 + $0x2a0] sm:%s5124_s30]  ;;  %v1579_v14 = vld [vmem:[%s3350_s9 + $0x2b0] sm:%s5124_s30] }
 0x35a   : > { %1578 = vst [vmem:[%s4493_s6 + $0x3f0] sm:%s5124_s30] %v1577_v8  ;;  %1580 = vst [vmem:[%s4493_s6 + $0x408] sm:%s5124_s30] %v1579_v14 }
 0x35b   : > { %v1581_v1 = vld [vmem:[%s3350_s9 + $0x2c0] sm:%s5124_s30]  ;;  %v1583_v19 = vld [vmem:[%s3350_s9 + $0x2d0] sm:%s5124_s30] }
 0x35c   : > { %1582 = vst [vmem:[%s4493_s6 + $0x420] sm:%s5124_s30] %v1581_v1  ;;  %1584 = vst [vmem:[%s4493_s6 + $0x438] sm:%s5124_s30] %v1583_v19 }
 0x35d   : > { %v1585_v45 = vld [vmem:[%s3350_s9 + $0x2e0] sm:%s5124_s30]  ;;  %v1587_v0 = vld [vmem:[%s3350_s9 + $0x2f0] sm:%s5124_s30] }
 0x35e   : > { %1586 = vst [vmem:[%s4493_s6 + $0x450] sm:%s5124_s30] %v1585_v45  ;;  %1588 = vst [vmem:[%s4493_s6 + $0x468] sm:%s5124_s30] %v1587_v0 }
 0x35f   : > { %v1589_v59 = vld [vmem:[%s3350_s9 + $0x300] sm:%s5124_s30]  ;;  %v1591_v34 = vld [vmem:[%s3350_s9 + $0x310] sm:%s5124_s30] }
 0x360   : > { %1590 = vst [vmem:[%s4493_s6 + $0x480] sm:%s5124_s30] %v1589_v59  ;;  %1592 = vst [vmem:[%s4493_s6 + $0x498] sm:%s5124_s30] %v1591_v34 }
 0x361   : > { %v1593_v18 = vld [vmem:[%s3350_s9 + $0x320] sm:%s5124_s30]  ;;  %v1595_v39 = vld [vmem:[%s3350_s9 + $0x330] sm:%s5124_s30] }
 0x362   : > { %1594 = vst [vmem:[%s4493_s6 + $0x4b0] sm:%s5124_s30] %v1593_v18  ;;  %1596 = vst [vmem:[%s4493_s6 + $0x4c8] sm:%s5124_s30] %v1595_v39 }
 0x363   : > { %v1597_v11 = vld [vmem:[%s3350_s9 + $0x340] sm:%s5124_s30]  ;;  %v1599_v20 = vld [vmem:[%s3350_s9 + $0x350] sm:%s5124_s30] }
 0x364   : > { %1598 = vst [vmem:[%s4493_s6 + $0x4e0] sm:%s5124_s30] %v1597_v11  ;;  %1600 = vst [vmem:[%s4493_s6 + $0x4f8] sm:%s5124_s30] %v1599_v20 }
 0x365   : > { %v1601_v41 = vld [vmem:[%s3350_s9 + $0x360] sm:%s5124_s30]  ;;  %v1603_v47 = vld [vmem:[%s3350_s9 + $0x370] sm:%s5124_s30] }
 0x366   : > { %1602 = vst [vmem:[%s4493_s6 + $0x510] sm:%s5124_s30] %v1601_v41  ;;  %1604 = vst [vmem:[%s4493_s6 + $0x528] sm:%s5124_s30] %v1603_v47 }
 0x367   : > { %v1605_v23 = vld [vmem:[%s3350_s9 + $0x380] sm:%s5124_s30]  ;;  %v1607_v30 = vld [vmem:[%s3350_s9 + $0x390] sm:%s5124_s30] }
 0x368   : > { %1606 = vst [vmem:[%s4493_s6 + $0x540] sm:%s5124_s30] %v1605_v23  ;;  %1608 = vst [vmem:[%s4493_s6 + $0x558] sm:%s5124_s30] %v1607_v30 }
 0x369   : > { %v1609_v61 = vld [vmem:[%s3350_s9 + $0x3a0] sm:%s5124_s30]  ;;  %v1611_v28 = vld [vmem:[%s3350_s9 + $0x3b0] sm:%s5124_s30] }
 0x36a   : > { %1610 = vst [vmem:[%s4493_s6 + $0x570] sm:%s5124_s30] %v1609_v61  ;;  %1612 = vst [vmem:[%s4493_s6 + $0x588] sm:%s5124_s30] %v1611_v28 }
 0x36b   : > { %v1613_v22 = vld [vmem:[%s3350_s9 + $0x3c0] sm:%s5124_s30]  ;;  %v1615_v54 = vld [vmem:[%s3350_s9 + $0x3d0] sm:%s5124_s30] }
 0x36c   : > { %1614 = vst [vmem:[%s4493_s6 + $0x5a0] sm:%s5124_s30] %v1613_v22  ;;  %1616 = vst [vmem:[%s4493_s6 + $0x5b8] sm:%s5124_s30] %v1615_v54 }
 0x36d   : > { %v1617_v57 = vld [vmem:[%s3350_s9 + $0x3e0] sm:%s5124_s30]  ;;  %v1619_v9 = vld [vmem:[%s3350_s9 + $0x3f0] sm:%s5124_s30] }
 0x36e   : > { %1618 = vst [vmem:[%s4493_s6 + $0x5d0] sm:%s5124_s30] %v1617_v57  ;;  %1620 = vst [vmem:[%s4493_s6 + $0x5e8] sm:%s5124_s30] %v1619_v9 }
 0x36f PF: > { %s18_s18 = sadd.s32 1, %s2628_s18   ;;  %s5542_s9 = smov %s2596_s10 }
 0x370   : > { %p15_p6 = scmp.ge.s32.totalorder %s18_s18, 4   ;;  %s5543_s10 = smov %s2759_s25 }
 0x371   : > { %s5544_s11 = smov %s2604_s12  ;;  %s5545_s12 = smov %s2608_s13 }
 0x372   : > { %s5546_s13 = smov %s2811_s24  ;;  %s5547_s14 = smov %s2616_s15 }
 0x373   : > { %s5401_s15 = smov 0   ;;  %s5548_s16 = smov %s2624_s17 }
 0x374   : > { %s5549_s17 = smov %s5551_s20  ;;  %17 = sbr.rel (!%p15_p6) target bundleno = 10 (0xa), region = 165 }
 0x379   :  { %2079 = vsyncpa [#allocation3], 1 }
 0x37a   :  { %2081 = vsyncpa [#allocation3 + $0x1], 1 }
 0x37b   :  { %2082 = vsyncpa [#allocation5], 1 }
 0x37c   :  { %2084 = vsyncpa [#allocation5 + $0x1], 1 }

</bundles_post_ra>
